<compile_context>
chip_gen: v6e
topology: v6e:2x2x1
jax: 0.10.0
libtpu: 0.0.40
codegen_flags: <defaults>
</compile_context>

<pallas_src>
import jax
import jax.numpy as jnp
from jax.experimental import pallas as pl
from jax.experimental.pallas import tpu as pltpu

L_IN = 20          # sequence length implied by the .view(B, 256) in forward()
C_IN = 26
ACTION_SIZE = 6
BATCH = 2
K1PAD = 256        # conv1 im2col window (130) zero-padded to a clean MXU K


def actor_kernel(x_ref, w1_ref, b1_ref, w2e_ref, w2o_ref, b2_ref,
                 w3_ref, b3_ref, wf1_ref, bf1_ref, wf2_ref, bf2_ref,
                 out_ref, p1pad_ref):
    f32, bf16 = jnp.float32, jnp.bfloat16
    TB = out_ref.shape[0]                 # samples handled in this grid step
    M2 = TB * 5                           # pool-positions x samples (position-major)
    PAD = (p1pad_ref.shape[0] - M2) // 2  # zero-pad rows each side (>= TB, 8-aligned)

    # ---- conv1 + tanh + maxpool1: one fused bf16 MXU dot --------------------
    # Each x row packs two conv1 positions (K = 512); the block-diagonal weight
    # emits [pool-even candidate | pool-odd candidate] in lanes 0-63 / 64-127.
    h = jnp.tanh(jnp.dot(x_ref[...], w1_ref[...], preferred_element_type=f32)
                 + b1_ref[...])                               # (2*M2, 128) f32
    p1 = jnp.maximum(h[:M2], h[M2:])                          # (M2, 128): [pE | pO]
    p1b = p1.astype(bf16)

    # Stage pool1 into a zero-padded, 128-lane bf16 scratch.  Position-major rows
    # make conv2's j-1 / j+1 windows contiguous slices; the zero pad rows are the
    # conv2 boundary padding, so no masks are needed.
    p1pad_ref[0:PAD, :] = jnp.zeros((PAD, 128), bf16)
    p1pad_ref[PAD + M2:PAD + M2 + PAD, :] = jnp.zeros((PAD, 128), bf16)
    p1pad_ref[PAD:PAD + M2, :] = p1b

    win_m = p1pad_ref[PAD - TB:PAD - TB + M2, :]              # pool positions j-1
    win_p = p1pad_ref[PAD + TB:PAD + TB + M2, :]              # pool positions j+1

    # ---- conv2 + tanh + maxpool2: 3+3 dots on prepacked tap-pair weights -----
    b2 = b2_ref[...]
    acc_e = (jnp.dot(win_m, w2e_ref[0], preferred_element_type=f32)
             + jnp.dot(p1b,  w2e_ref[1], preferred_element_type=f32)
             + jnp.dot(win_p, w2e_ref[2], preferred_element_type=f32))
    acc_o = (jnp.dot(win_m, w2o_ref[0], preferred_element_type=f32)
             + jnp.dot(p1b,  w2o_ref[1], preferred_element_type=f32)
             + jnp.dot(win_p, w2o_ref[2], preferred_element_type=f32))
    p2 = jnp.maximum(jnp.tanh(acc_e + b2), jnp.tanh(acc_o + b2))   # (M2, 128)
    p2b = p2.astype(bf16)

    # ---- conv3 (Lout == 1): five tap dots on contiguous (TB, 128) blocks -----
    acc3 = b3_ref[...] + jnp.dot(p2b[0:TB], w3_ref[0], preferred_element_type=f32)
    for k in range(1, 5):                 # short fixed tap loop, trace-time unrolled
        acc3 = acc3 + jnp.dot(p2b[k * TB:(k + 1) * TB], w3_ref[k],
                              preferred_element_type=f32)
    h3 = jnp.tanh(acc3).astype(bf16)                          # (TB, 256)

    # ---- fc: 256 -> 64 (tanh) -> 128 (lane-dense padded action head) ---------
    f1 = jnp.tanh(jnp.dot(h3, wf1_ref[...], preferred_element_type=f32)
                  + bf1_ref[...]).astype(bf16)                # (TB, 64)
    out = jnp.dot(f1, wf2_ref[...], preferred_element_type=f32) + bf2_ref[...]
    out_ref[...] = out.astype(out_ref.dtype)


def _default_samples_per_step(B):
    # Prefer >=2 grid steps (v7x megacore) with TB a multiple of 8, capped near
    # the MXU M sweet spot.  VMEM is never the constraint for this network.
    if B % 16 != 0:
        return B
    tb = B // 2
    while tb > 128 and B % (tb // 2) == 0 and (tb // 2) % 8 == 0:
        tb //= 2
    return tb


def actor_forward(x_ncw, params, *, samples_per_step=None):
    """x_ncw: (B, 26, 20) float32, PyTorch NCW layout. Returns (B, action_size)."""
    B, C, L = x_ncw.shape
    assert C == C_IN and L == L_IN, "network requires (B, 26, 20) inputs"
    A = params["bf2"].shape[1]
    TB = _default_samples_per_step(B) if samples_per_step is None else samples_per_step
    assert B % TB == 0 and (TB == B or TB % 8 == 0)
    M2 = TB * 5
    PAD = ((max(TB, 8) + 7) // 8) * 8          # scratch pad rows per side (>= TB)

    f32, bf16 = jnp.float32, jnp.bfloat16

    # ---- host-side conv1 im2col, two positions packed per matmul row ---------
    # TODO(synk): for very large B on v5e, build the taps in-kernel with
    # pltpu.roll instead of this ~5x HBM inflation of the input stream.
    x = jnp.transpose(x_ncw, (0, 2, 1)).astype(f32)            # (B, 20, 26)
    xp = jnp.pad(x, ((0, 0), (2, 2), (0, 0)))                  # (B, 24, 26)
    xi = jnp.concatenate([xp[:, k:k + L_IN, :] for k in range(5)], axis=2)  # (B,20,130)
    xi = jnp.pad(xi, ((0, 0), (0, 0), (0, K1PAD - 5 * C_IN)))  # (B, 20, 256)

    def tile_rows(c):      # (B, 5, 2*K1PAD) -> (B//TB, TB*5, 2*K1PAD), position-major
        c = c.reshape(B // TB, TB, 5, 2 * K1PAD).transpose(0, 2, 1, 3)
        return c.reshape(B // TB, M2, 2 * K1PAD)

    c0 = tile_rows(jnp.concatenate([xi[:, 0::4, :], xi[:, 2::4, :]], axis=2))
    c1 = tile_rows(jnp.concatenate([xi[:, 1::4, :], xi[:, 3::4, :]], axis=2))
    x_big = jnp.concatenate([c0, c1], axis=1).reshape(2 * B * 5, 2 * K1PAD).astype(bf16)

    # ---- weight prep: bf16, MXU-ready layouts ---------------------------------
    w1f = params["w1"].reshape(5 * C_IN, 64)
    w1big = (jnp.zeros((2 * K1PAD, 128), f32)
             .at[:5 * C_IN, :64].set(w1f)
             .at[K1PAD:K1PAD + 5 * C_IN, 64:].set(w1f)).astype(bf16)
    b1big = jnp.concatenate([params["b1"], params["b1"]], axis=1)   # (1, 128)

    w2 = params["w2"]                                           # (5, 64, 128)
    z64 = jnp.zeros((64, 128), f32)
    w2e = jnp.stack([jnp.concatenate([w2[0], w2[1]], axis=0),
                     jnp.concatenate([w2[2], w2[3]], axis=0),
                     jnp.concatenate([w2[4], z64], axis=0)]).astype(bf16)   # (3,128,128)
    w2o = jnp.stack([jnp.concatenate([z64, w2[0]], axis=0),
                     jnp.concatenate([w2[1], w2[2]], axis=0),
                     jnp.concatenate([w2[3], w2[4]], axis=0)]).astype(bf16)

    w3 = params["w3"].astype(bf16)                              # (5, 128, 256)
    wf1 = params["wf1"].astype(bf16)                            # (256, 64)
    wf2p = jnp.zeros((64, 128), f32).at[:, :A].set(params["wf2"]).astype(bf16)
    bf2p = jnp.zeros((1, 128), f32).at[:, :A].set(params["bf2"])

    def wspec(shape):      # constant-index weight blocks: not re-fetched per step
        return pl.BlockSpec(shape, lambda i, _n=len(shape): (0,) * _n)

    grid_spec = pltpu.PrefetchScalarGridSpec(
        num_scalar_prefetch=0,
        grid=(B // TB,),
        in_specs=[
            pl.BlockSpec((2 * M2, 2 * K1PAD), lambda i: (i, 0)),
            wspec((2 * K1PAD, 128)), wspec((1, 128)),
            wspec((3, 128, 128)),    wspec((3, 128, 128)), wspec((1, 128)),
            wspec((5, 128, 256)),    wspec((1, 256)),
            wspec((256, 64)),        wspec((1, 64)),
            wspec((64, 128)),        wspec((1, 128)),
        ],
        out_specs=pl.BlockSpec((TB, 128), lambda i: (i, 0)),
        scratch_shapes=[pltpu.VMEM((2 * PAD + M2, 128), jnp.bfloat16)],
    )

    out = pl.pallas_call(
        actor_kernel,
        out_shape=jax.ShapeDtypeStruct((B, 128), jnp.float32),
        grid_spec=grid_spec,
        compiler_params=pltpu.CompilerParams(dimension_semantics=("parallel",)),
    )(x_big, w1big, b1big, w2e, w2o, params["b2"], w3, params["b3"],
      wf1, params["bf1"], wf2p, bf2p)
    return out[:, :A]


def init_params(key, action_size):
    """Deterministic synthetic init (PyTorch-style uniform(-1/sqrt(fan_in), ...))."""
    def uni(k, shape, fan_in):
        bound = 1.0 / (fan_in ** 0.5)
        return jax.random.uniform(k, shape, jnp.float32, -bound, bound)

    ks = jax.random.split(key, 10)
    return {
        # conv weights stored tap-major: (K, Cin, Cout) == torch (Cout, Cin, K) transposed
        "w1":  uni(ks[0], (5, 26, 64),   26 * 5),  "b1":  uni(ks[1], (1, 64),   26 * 5),
        "w2":  uni(ks[2], (5, 64, 128),  64 * 5),  "b2":  uni(ks[3], (1, 128),  64 * 5),
        "w3":  uni(ks[4], (5, 128, 256), 128 * 5), "b3":  uni(ks[5], (1, 256), 128 * 5),
        # fc weights stored as (in, out) == torch weight.T
        "wf1": uni(ks[6], (256, 64), 256),         "bf1": uni(ks[7], (1, 64), 256),
        "wf2": uni(ks[8], (64, action_size), 64),  "bf2": uni(ks[9], (1, action_size), 64),
    }


def actor_forward_ref(x_ncw, p):
    """Pure-JAX reference for validation."""
    x = jnp.transpose(x_ncw, (0, 2, 1))  # (B, L, C)

    def conv(x, w, b, pad):
        K = w.shape[0]
        if pad:
            x = jnp.pad(x, ((0, 0), (pad, pad), (0, 0)))
        lout = x.shape[1] - K + 1
        out = sum(jnp.einsum("blc,cd->bld", x[:, k:k + lout, :], w[k]) for k in range(K))
        return out + b

    h = jnp.tanh(conv(x, p["w1"], p["b1"], 2))
    h = jnp.maximum(h[:, 0::2, :], h[:, 1::2, :])
    h = jnp.tanh(conv(h, p["w2"], p["b2"], 2))
    h = jnp.maximum(h[:, 0::2, :], h[:, 1::2, :])
    h = jnp.tanh(conv(h, p["w3"], p["b3"], 0))
    h = h.reshape(h.shape[0], -1)
    h = jnp.tanh(h @ p["wf1"] + p["bf1"])
    return h @ p["wf2"] + p["bf2"]


# TODO(synk): select_action() uses torch.multinomial (sampling); not part of forward(), omitted.

if __name__ == "__main__":
    key = jax.random.PRNGKey(0)
    kx, kp = jax.random.split(key)
    x = jax.random.normal(kx, (BATCH, C_IN, L_IN), dtype=jnp.float32)  # PyTorch NCW
    params = init_params(kp, ACTION_SIZE)

    out = jax.block_until_ready(actor_forward(x, params))
    assert out.shape == (BATCH, ACTION_SIZE)

    # Check against the bf16-rounded weights the kernel actually consumes ...
    params_q = {k: (v.astype(jnp.bfloat16).astype(jnp.float32) if k.startswith("w") else v)
                for k, v in params.items()}
    ref_q = actor_forward_ref(x, params_q)
    assert jnp.allclose(out, ref_q, atol=2e-2, rtol=2e-2), (out, ref_q)

    # ... and against the original full-f32 weights (bf16 quantization tolerance).
    ref_f32 = actor_forward_ref(x, params)
    assert jnp.allclose(out, ref_f32, atol=5e-2, rtol=5e-2), (out, ref_f32)

    print("KERNEL_OK")
</pallas_src>

<mosaic_0001>
module attributes {stable_mosaic.version = 11 : i64} {
  func.func @actor_kernel(%arg0: i32, %arg1: memref<20x512xbf16, #tpu.memory_space<vmem>>, %arg2: memref<512x128xbf16, #tpu.memory_space<vmem>>, %arg3: memref<1x128xf32, #tpu.memory_space<vmem>>, %arg4: memref<3x128x128xbf16, #tpu.memory_space<vmem>>, %arg5: memref<3x128x128xbf16, #tpu.memory_space<vmem>>, %arg6: memref<1x128xf32, #tpu.memory_space<vmem>>, %arg7: memref<5x128x256xbf16, #tpu.memory_space<vmem>>, %arg8: memref<1x256xf32, #tpu.memory_space<vmem>>, %arg9: memref<256x64xbf16, #tpu.memory_space<vmem>>, %arg10: memref<1x64xf32, #tpu.memory_space<vmem>>, %arg11: memref<64x128xbf16, #tpu.memory_space<vmem>>, %arg12: memref<1x128xf32, #tpu.memory_space<vmem>>, %arg13: memref<2x128xf32, #tpu.memory_space<vmem>>, %arg14: memref<26x128xbf16, #tpu.memory_space<vmem>>) attributes {dimension_semantics = [#tpu.dimension_semantics<parallel>], iteration_bounds = array<i64: 1>, scalar_prefetch = 0 : i64, scratch_operands = 1 : i64, tpu.core_type = #tpu.core_type<tc>, window_params = [{transform_indices = @transform_0, window_bounds = array<i64: 20, 512>}, {pipeline_mode = #tpu.pipeline_mode<synchronous>, transform_indices = @transform_1, window_bounds = array<i64: 512, 128>}, {pipeline_mode = #tpu.pipeline_mode<synchronous>, transform_indices = @transform_2, window_bounds = array<i64: 1, 128>}, {pipeline_mode = #tpu.pipeline_mode<synchronous>, transform_indices = @transform_3, window_bounds = array<i64: 3, 128, 128>}, {pipeline_mode = #tpu.pipeline_mode<synchronous>, transform_indices = @transform_4, window_bounds = array<i64: 3, 128, 128>}, {pipeline_mode = #tpu.pipeline_mode<synchronous>, transform_indices = @transform_5, window_bounds = array<i64: 1, 128>}, {pipeline_mode = #tpu.pipeline_mode<synchronous>, transform_indices = @transform_6, window_bounds = array<i64: 5, 128, 256>}, {pipeline_mode = #tpu.pipeline_mode<synchronous>, transform_indices = @transform_7, window_bounds = array<i64: 1, 256>}, {pipeline_mode = #tpu.pipeline_mode<synchronous>, transform_indices = @transform_8, window_bounds = array<i64: 256, 64>}, {pipeline_mode = #tpu.pipeline_mode<synchronous>, transform_indices = @transform_9, window_bounds = array<i64: 1, 64>}, {pipeline_mode = #tpu.pipeline_mode<synchronous>, transform_indices = @transform_10, window_bounds = array<i64: 64, 128>}, {pipeline_mode = #tpu.pipeline_mode<synchronous>, transform_indices = @transform_11, window_bounds = array<i64: 1, 128>}, {transform_indices = @transform_12, window_bounds = array<i64: 2, 128>}]} {
    %c0 = arith.constant 0 : index
    %c0_0 = arith.constant 0 : index
    %0 = vector.load %arg1[%c0, %c0_0] : memref<20x512xbf16, #tpu.memory_space<vmem>>, vector<20x512xbf16>
    %c0_1 = arith.constant 0 : index
    %c0_2 = arith.constant 0 : index
    %1 = vector.load %arg2[%c0_1, %c0_2] : memref<512x128xbf16, #tpu.memory_space<vmem>>, vector<512x128xbf16>
    %cst = arith.constant dense<0.000000e+00> : vector<20x128xf32>
    %2 = tpu.matmul %0, %1, %cst {dimension_numbers = #tpu.dot_dimension_numbers<[1], [0], [0], [1], [0, 0, 1, 1], [], []>} : vector<20x512xbf16>, vector<512x128xbf16>, vector<20x128xf32> -> vector<20x128xf32>
    %c0_3 = arith.constant 0 : index
    %c0_4 = arith.constant 0 : index
    %3 = vector.load %arg3[%c0_3, %c0_4] : memref<1x128xf32, #tpu.memory_space<vmem>>, vector<1x128xf32>
    %4 = vector.broadcast %3 : vector<1x128xf32> to vector<20x128xf32>
    %5 = arith.addf %2, %4 : vector<20x128xf32>
    %6 = math.tanh %5 : vector<20x128xf32>
    %7 = vector.extract_strided_slice %6 {offsets = [0, 0], sizes = [10, 128], strides = [1, 1]} : vector<20x128xf32> to vector<10x128xf32>
    %8 = vector.extract_strided_slice %6 {offsets = [10, 0], sizes = [10, 128], strides = [1, 1]} : vector<20x128xf32> to vector<10x128xf32>
    %9 = arith.maximumf %7, %8 : vector<10x128xf32>
    %10 = arith.truncf %9 : vector<10x128xf32> to vector<10x128xbf16>
    %cst_5 = arith.constant 0.000000e+00 : bf16
    %11 = vector.broadcast %cst_5 : bf16 to vector<8x128xbf16>
    %c0_6 = arith.constant 0 : index
    %c0_7 = arith.constant 0 : index
    %12 = vector.load %arg14[%c0_6, %c0_7] : memref<26x128xbf16, #tpu.memory_space<vmem>>, vector<8x128xbf16>
    tpu.vector_store %arg14[%c0_6, %c0_7], %11 {strides = array<i32>} : memref<26x128xbf16, #tpu.memory_space<vmem>>, vector<8x128xbf16>,
    %cst_8 = arith.constant 0.000000e+00 : bf16
    %13 = vector.broadcast %cst_8 : bf16 to vector<8x128xbf16>
    %c18 = arith.constant 18 : index
    %c0_9 = arith.constant 0 : index
    %14 = vector.load %arg14[%c18, %c0_9] : memref<26x128xbf16, #tpu.memory_space<vmem>>, vector<8x128xbf16>
    tpu.vector_store %arg14[%c18, %c0_9], %13 {strides = array<i32>} : memref<26x128xbf16, #tpu.memory_space<vmem>>, vector<8x128xbf16>,
    %c8 = arith.constant 8 : index
    %c0_10 = arith.constant 0 : index
    %15 = vector.load %arg14[%c8, %c0_10] : memref<26x128xbf16, #tpu.memory_space<vmem>>, vector<10x128xbf16>
    tpu.vector_store %arg14[%c8, %c0_10], %10 {strides = array<i32>} : memref<26x128xbf16, #tpu.memory_space<vmem>>, vector<10x128xbf16>,
    %c6 = arith.constant 6 : index
    %c0_11 = arith.constant 0 : index
    %16 = vector.load %arg14[%c6, %c0_11] : memref<26x128xbf16, #tpu.memory_space<vmem>>, vector<10x128xbf16>
    %c10 = arith.constant 10 : index
    %c0_12 = arith.constant 0 : index
    %17 = vector.load %arg14[%c10, %c0_12] : memref<26x128xbf16, #tpu.memory_space<vmem>>, vector<10x128xbf16>
    %c0_13 = arith.constant 0 : index
    %c0_14 = arith.constant 0 : index
    %18 = vector.load %arg6[%c0_13, %c0_14] : memref<1x128xf32, #tpu.memory_space<vmem>>, vector<1x128xf32>
    %c0_15 = arith.constant 0 : index
    %c0_16 = arith.constant 0 : index
    %c0_17 = arith.constant 0 : index
    %19 = vector.load %arg4[%c0_15, %c0_16, %c0_17] : memref<3x128x128xbf16, #tpu.memory_space<vmem>>, vector<1x128x128xbf16>
    %20 = vector.shape_cast %19 : vector<1x128x128xbf16> to vector<128x128xbf16>
    %cst_18 = arith.constant dense<0.000000e+00> : vector<10x128xf32>
    %21 = tpu.matmul %16, %20, %cst_18 {dimension_numbers = #tpu.dot_dimension_numbers<[1], [0], [0], [1], [0, 0, 1, 1], [], []>} : vector<10x128xbf16>, vector<128x128xbf16>, vector<10x128xf32> -> vector<10x128xf32>
    %c1 = arith.constant 1 : index
    %c0_19 = arith.constant 0 : index
    %c0_20 = arith.constant 0 : index
    %22 = vector.load %arg4[%c1, %c0_19, %c0_20] : memref<3x128x128xbf16, #tpu.memory_space<vmem>>, vector<1x128x128xbf16>
    %23 = vector.shape_cast %22 : vector<1x128x128xbf16> to vector<128x128xbf16>
    %cst_21 = arith.constant dense<0.000000e+00> : vector<10x128xf32>
    %24 = tpu.matmul %10, %23, %cst_21 {dimension_numbers = #tpu.dot_dimension_numbers<[1], [0], [0], [1], [0, 0, 1, 1], [], []>} : vector<10x128xbf16>, vector<128x128xbf16>, vector<10x128xf32> -> vector<10x128xf32>
    %25 = arith.addf %21, %24 : vector<10x128xf32>
    %c2 = arith.constant 2 : index
    %c0_22 = arith.constant 0 : index
    %c0_23 = arith.constant 0 : index
    %26 = vector.load %arg4[%c2, %c0_22, %c0_23] : memref<3x128x128xbf16, #tpu.memory_space<vmem>>, vector<1x128x128xbf16>
    %27 = vector.shape_cast %26 : vector<1x128x128xbf16> to vector<128x128xbf16>
    %cst_24 = arith.constant dense<0.000000e+00> : vector<10x128xf32>
    %28 = tpu.matmul %17, %27, %cst_24 {dimension_numbers = #tpu.dot_dimension_numbers<[1], [0], [0], [1], [0, 0, 1, 1], [], []>} : vector<10x128xbf16>, vector<128x128xbf16>, vector<10x128xf32> -> vector<10x128xf32>
    %29 = arith.addf %25, %28 : vector<10x128xf32>
    %c0_25 = arith.constant 0 : index
    %c0_26 = arith.constant 0 : index
    %c0_27 = arith.constant 0 : index
    %30 = vector.load %arg5[%c0_25, %c0_26, %c0_27] : memref<3x128x128xbf16, #tpu.memory_space<vmem>>, vector<1x128x128xbf16>
    %31 = vector.shape_cast %30 : vector<1x128x128xbf16> to vector<128x128xbf16>
    %cst_28 = arith.constant dense<0.000000e+00> : vector<10x128xf32>
    %32 = tpu.matmul %16, %31, %cst_28 {dimension_numbers = #tpu.dot_dimension_numbers<[1], [0], [0], [1], [0, 0, 1, 1], [], []>} : vector<10x128xbf16>, vector<128x128xbf16>, vector<10x128xf32> -> vector<10x128xf32>
    %c1_29 = arith.constant 1 : index
    %c0_30 = arith.constant 0 : index
    %c0_31 = arith.constant 0 : index
    %33 = vector.load %arg5[%c1_29, %c0_30, %c0_31] : memref<3x128x128xbf16, #tpu.memory_space<vmem>>, vector<1x128x128xbf16>
    %34 = vector.shape_cast %33 : vector<1x128x128xbf16> to vector<128x128xbf16>
    %cst_32 = arith.constant dense<0.000000e+00> : vector<10x128xf32>
    %35 = tpu.matmul %10, %34, %cst_32 {dimension_numbers = #tpu.dot_dimension_numbers<[1], [0], [0], [1], [0, 0, 1, 1], [], []>} : vector<10x128xbf16>, vector<128x128xbf16>, vector<10x128xf32> -> vector<10x128xf32>
    %36 = arith.addf %32, %35 : vector<10x128xf32>
    %c2_33 = arith.constant 2 : index
    %c0_34 = arith.constant 0 : index
    %c0_35 = arith.constant 0 : index
    %37 = vector.load %arg5[%c2_33, %c0_34, %c0_35] : memref<3x128x128xbf16, #tpu.memory_space<vmem>>, vector<1x128x128xbf16>
    %38 = vector.shape_cast %37 : vector<1x128x128xbf16> to vector<128x128xbf16>
    %cst_36 = arith.constant dense<0.000000e+00> : vector<10x128xf32>
    %39 = tpu.matmul %17, %38, %cst_36 {dimension_numbers = #tpu.dot_dimension_numbers<[1], [0], [0], [1], [0, 0, 1, 1], [], []>} : vector<10x128xbf16>, vector<128x128xbf16>, vector<10x128xf32> -> vector<10x128xf32>
    %40 = arith.addf %36, %39 : vector<10x128xf32>
    %41 = vector.broadcast %18 : vector<1x128xf32> to vector<10x128xf32>
    %42 = arith.addf %29, %41 : vector<10x128xf32>
    %43 = math.tanh %42 : vector<10x128xf32>
    %44 = vector.broadcast %18 : vector<1x128xf32> to vector<10x128xf32>
    %45 = arith.addf %40, %44 : vector<10x128xf32>
    %46 = math.tanh %45 : vector<10x128xf32>
    %47 = arith.maximumf %43, %46 : vector<10x128xf32>
    %48 = arith.truncf %47 : vector<10x128xf32> to vector<10x128xbf16>
    %c0_37 = arith.constant 0 : index
    %c0_38 = arith.constant 0 : index
    %49 = vector.load %arg8[%c0_37, %c0_38] : memref<1x256xf32, #tpu.memory_space<vmem>>, vector<1x256xf32>
    %50 = vector.extract_strided_slice %48 {offsets = [0, 0], sizes = [2, 128], strides = [1, 1]} : vector<10x128xbf16> to vector<2x128xbf16>
    %c0_39 = arith.constant 0 : index
    %c0_40 = arith.constant 0 : index
    %c0_41 = arith.constant 0 : index
    %51 = vector.load %arg7[%c0_39, %c0_40, %c0_41] : memref<5x128x256xbf16, #tpu.memory_space<vmem>>, vector<1x128x256xbf16>
    %52 = vector.shape_cast %51 : vector<1x128x256xbf16> to vector<128x256xbf16>
    %cst_42 = arith.constant dense<0.000000e+00> : vector<2x256xf32>
    %53 = tpu.matmul %50, %52, %cst_42 {dimension_numbers = #tpu.dot_dimension_numbers<[1], [0], [0], [1], [0, 0, 1, 1], [], []>} : vector<2x128xbf16>, vector<128x256xbf16>, vector<2x256xf32> -> vector<2x256xf32>
    %54 = vector.broadcast %49 : vector<1x256xf32> to vector<2x256xf32>
    %55 = arith.addf %54, %53 : vector<2x256xf32>
    %56 = vector.extract_strided_slice %48 {offsets = [2, 0], sizes = [2, 128], strides = [1, 1]} : vector<10x128xbf16> to vector<2x128xbf16>
    %c1_43 = arith.constant 1 : index
    %c0_44 = arith.constant 0 : index
    %c0_45 = arith.constant 0 : index
    %57 = vector.load %arg7[%c1_43, %c0_44, %c0_45] : memref<5x128x256xbf16, #tpu.memory_space<vmem>>, vector<1x128x256xbf16>
    %58 = vector.shape_cast %57 : vector<1x128x256xbf16> to vector<128x256xbf16>
    %cst_46 = arith.constant dense<0.000000e+00> : vector<2x256xf32>
    %59 = tpu.matmul %56, %58, %cst_46 {dimension_numbers = #tpu.dot_dimension_numbers<[1], [0], [0], [1], [0, 0, 1, 1], [], []>} : vector<2x128xbf16>, vector<128x256xbf16>, vector<2x256xf32> -> vector<2x256xf32>
    %60 = arith.addf %55, %59 : vector<2x256xf32>
    %61 = vector.extract_strided_slice %48 {offsets = [4, 0], sizes = [2, 128], strides = [1, 1]} : vector<10x128xbf16> to vector<2x128xbf16>
    %c2_47 = arith.constant 2 : index
    %c0_48 = arith.constant 0 : index
    %c0_49 = arith.constant 0 : index
    %62 = vector.load %arg7[%c2_47, %c0_48, %c0_49] : memref<5x128x256xbf16, #tpu.memory_space<vmem>>, vector<1x128x256xbf16>
    %63 = vector.shape_cast %62 : vector<1x128x256xbf16> to vector<128x256xbf16>
    %cst_50 = arith.constant dense<0.000000e+00> : vector<2x256xf32>
    %64 = tpu.matmul %61, %63, %cst_50 {dimension_numbers = #tpu.dot_dimension_numbers<[1], [0], [0], [1], [0, 0, 1, 1], [], []>} : vector<2x128xbf16>, vector<128x256xbf16>, vector<2x256xf32> -> vector<2x256xf32>
    %65 = arith.addf %60, %64 : vector<2x256xf32>
    %66 = vector.extract_strided_slice %48 {offsets = [6, 0], sizes = [2, 128], strides = [1, 1]} : vector<10x128xbf16> to vector<2x128xbf16>
    %c3 = arith.constant 3 : index
    %c0_51 = arith.constant 0 : index
    %c0_52 = arith.constant 0 : index
    %67 = vector.load %arg7[%c3, %c0_51, %c0_52] : memref<5x128x256xbf16, #tpu.memory_space<vmem>>, vector<1x128x256xbf16>
    %68 = vector.shape_cast %67 : vector<1x128x256xbf16> to vector<128x256xbf16>
    %cst_53 = arith.constant dense<0.000000e+00> : vector<2x256xf32>
    %69 = tpu.matmul %66, %68, %cst_53 {dimension_numbers = #tpu.dot_dimension_numbers<[1], [0], [0], [1], [0, 0, 1, 1], [], []>} : vector<2x128xbf16>, vector<128x256xbf16>, vector<2x256xf32> -> vector<2x256xf32>
    %70 = arith.addf %65, %69 : vector<2x256xf32>
    %71 = vector.extract_strided_slice %48 {offsets = [8, 0], sizes = [2, 128], strides = [1, 1]} : vector<10x128xbf16> to vector<2x128xbf16>
    %c4 = arith.constant 4 : index
    %c0_54 = arith.constant 0 : index
    %c0_55 = arith.constant 0 : index
    %72 = vector.load %arg7[%c4, %c0_54, %c0_55] : memref<5x128x256xbf16, #tpu.memory_space<vmem>>, vector<1x128x256xbf16>
    %73 = vector.shape_cast %72 : vector<1x128x256xbf16> to vector<128x256xbf16>
    %cst_56 = arith.constant dense<0.000000e+00> : vector<2x256xf32>
    %74 = tpu.matmul %71, %73, %cst_56 {dimension_numbers = #tpu.dot_dimension_numbers<[1], [0], [0], [1], [0, 0, 1, 1], [], []>} : vector<2x128xbf16>, vector<128x256xbf16>, vector<2x256xf32> -> vector<2x256xf32>
    %75 = arith.addf %70, %74 : vector<2x256xf32>
    %76 = math.tanh %75 : vector<2x256xf32>
    %77 = arith.truncf %76 : vector<2x256xf32> to vector<2x256xbf16>
    %c0_57 = arith.constant 0 : index
    %c0_58 = arith.constant 0 : index
    %78 = vector.load %arg9[%c0_57, %c0_58] : memref<256x64xbf16, #tpu.memory_space<vmem>>, vector<256x64xbf16>
    %cst_59 = arith.constant dense<0.000000e+00> : vector<2x64xf32>
    %79 = tpu.matmul %77, %78, %cst_59 {dimension_numbers = #tpu.dot_dimension_numbers<[1], [0], [0], [1], [0, 0, 1, 1], [], []>} : vector<2x256xbf16>, vector<256x64xbf16>, vector<2x64xf32> -> vector<2x64xf32>
    %c0_60 = arith.constant 0 : index
    %c0_61 = arith.constant 0 : index
    %80 = vector.load %arg10[%c0_60, %c0_61] : memref<1x64xf32, #tpu.memory_space<vmem>>, vector<1x64xf32>
    %81 = vector.broadcast %80 : vector<1x64xf32> to vector<2x64xf32>
    %82 = arith.addf %79, %81 : vector<2x64xf32>
    %83 = math.tanh %82 : vector<2x64xf32>
    %84 = arith.truncf %83 : vector<2x64xf32> to vector<2x64xbf16>
    %c0_62 = arith.constant 0 : index
    %c0_63 = arith.constant 0 : index
    %85 = vector.load %arg11[%c0_62, %c0_63] : memref<64x128xbf16, #tpu.memory_space<vmem>>, vector<64x128xbf16>
    %cst_64 = arith.constant dense<0.000000e+00> : vector<2x128xf32>
    %86 = tpu.matmul %84, %85, %cst_64 {dimension_numbers = #tpu.dot_dimension_numbers<[1], [0], [0], [1], [0, 0, 1, 1], [], []>} : vector<2x64xbf16>, vector<64x128xbf16>, vector<2x128xf32> -> vector<2x128xf32>
    %c0_65 = arith.constant 0 : index
    %c0_66 = arith.constant 0 : index
    %87 = vector.load %arg12[%c0_65, %c0_66] : memref<1x128xf32, #tpu.memory_space<vmem>>, vector<1x128xf32>
    %88 = vector.broadcast %87 : vector<1x128xf32> to vector<2x128xf32>
    %89 = arith.addf %86, %88 : vector<2x128xf32>
    %c0_67 = arith.constant 0 : index
    %c0_68 = arith.constant 0 : index
    %90 = vector.load %arg13[%c0_67, %c0_68] : memref<2x128xf32, #tpu.memory_space<vmem>>, vector<2x128xf32>
    tpu.vector_store %arg13[%c0_67, %c0_68], %89 {strides = array<i32>} : memref<2x128xf32, #tpu.memory_space<vmem>>, vector<2x128xf32>,
    return
  }
  func.func @transform_0(%arg0: i32) -> (i32, i32) {
    %c0_i32 = arith.constant 0 : i32
    %c0_i32_0 = arith.constant 0 : i32
    return %arg0, %c0_i32 : i32, i32
  }
  func.func @transform_1(%arg0: i32) -> (i32, i32) {
    %c0_i32 = arith.constant 0 : i32
    %c0_i32_0 = arith.constant 0 : i32
    %c0_i32_1 = arith.constant 0 : i32
    return %c0_i32, %c0_i32_0 : i32, i32
  }
  func.func @transform_2(%arg0: i32) -> (i32, i32) {
    %c0_i32 = arith.constant 0 : i32
    %c0_i32_0 = arith.constant 0 : i32
    %c0_i32_1 = arith.constant 0 : i32
    return %c0_i32, %c0_i32_0 : i32, i32
  }
  func.func @transform_3(%arg0: i32) -> (i32, i32, i32) {
    %c0_i32 = arith.constant 0 : i32
    %c0_i32_0 = arith.constant 0 : i32
    %c0_i32_1 = arith.constant 0 : i32
    %c0_i32_2 = arith.constant 0 : i32
    return %c0_i32, %c0_i32_0, %c0_i32_1 : i32, i32, i32
  }
  func.func @transform_4(%arg0: i32) -> (i32, i32, i32) {
    %c0_i32 = arith.constant 0 : i32
    %c0_i32_0 = arith.constant 0 : i32
    %c0_i32_1 = arith.constant 0 : i32
    %c0_i32_2 = arith.constant 0 : i32
    return %c0_i32, %c0_i32_0, %c0_i32_1 : i32, i32, i32
  }
  func.func @transform_5(%arg0: i32) -> (i32, i32) {
    %c0_i32 = arith.constant 0 : i32
    %c0_i32_0 = arith.constant 0 : i32
    %c0_i32_1 = arith.constant 0 : i32
    return %c0_i32, %c0_i32_0 : i32, i32
  }
  func.func @transform_6(%arg0: i32) -> (i32, i32, i32) {
    %c0_i32 = arith.constant 0 : i32
    %c0_i32_0 = arith.constant 0 : i32
    %c0_i32_1 = arith.constant 0 : i32
    %c0_i32_2 = arith.constant 0 : i32
    return %c0_i32, %c0_i32_0, %c0_i32_1 : i32, i32, i32
  }
  func.func @transform_7(%arg0: i32) -> (i32, i32) {
    %c0_i32 = arith.constant 0 : i32
    %c0_i32_0 = arith.constant 0 : i32
    %c0_i32_1 = arith.constant 0 : i32
    return %c0_i32, %c0_i32_0 : i32, i32
  }
  func.func @transform_8(%arg0: i32) -> (i32, i32) {
    %c0_i32 = arith.constant 0 : i32
    %c0_i32_0 = arith.constant 0 : i32
    %c0_i32_1 = arith.constant 0 : i32
    return %c0_i32, %c0_i32_0 : i32, i32
  }
  func.func @transform_9(%arg0: i32) -> (i32, i32) {
    %c0_i32 = arith.constant 0 : i32
    %c0_i32_0 = arith.constant 0 : i32
    %c0_i32_1 = arith.constant 0 : i32
    return %c0_i32, %c0_i32_0 : i32, i32
  }
  func.func @transform_10(%arg0: i32) -> (i32, i32) {
    %c0_i32 = arith.constant 0 : i32
    %c0_i32_0 = arith.constant 0 : i32
    %c0_i32_1 = arith.constant 0 : i32
    return %c0_i32, %c0_i32_0 : i32, i32
  }
  func.func @transform_11(%arg0: i32) -> (i32, i32) {
    %c0_i32 = arith.constant 0 : i32
    %c0_i32_0 = arith.constant 0 : i32
    %c0_i32_1 = arith.constant 0 : i32
    return %c0_i32, %c0_i32_0 : i32, i32
  }
  func.func @transform_12(%arg0: i32) -> (i32, i32) {
    %c0_i32 = arith.constant 0 : i32
    %c0_i32_0 = arith.constant 0 : i32
    return %arg0, %c0_i32 : i32, i32
  }
}

</mosaic_0001>

<bundles_post_ra>
// kernel: tpu_custom_call.1
= control target key start
LH: loop header
LB: loop body
LE: loop exit
PB: predicated region body
PF: predicated region fallthrough
CT: control target
= control target key end

     0   :  { %17 = vsyncpa [#allocation4], 0  ;;  %s3443_s0 = inlined_call_operand.hbm [shape: bf16[20,512], index: 0, kind: input, shape index: {}]   ;;  %s3444_s1 = inlined_call_operand.hbm [shape: bf16[512,128], index: 1, kind: input, shape index: {}]   ;;  %s3445_s2 = inlined_call_operand.vmem [shape: f32[1,128], index: 2, kind: input, shape index: {}]   ;;  %s3446_s3 = inlined_call_operand.vmem [shape: bf16[3,128,128], index: 3, kind: input, shape index: {}]   ;;  %s3447_s4 = inlined_call_operand.hbm [shape: bf16[3,128,128], index: 4, kind: input, shape index: {}]   ;;  %s3448_s5 = inlined_call_operand.vmem [shape: f32[1,128], index: 5, kind: input, shape index: {}]   ;;  %s3449_s6 = inlined_call_operand.hbm [shape: bf16[5,128,256], index: 6, kind: input, shape index: {}]   ;;  %s3450_s7 = inlined_call_operand.vmem [shape: f32[1,256], index: 7, kind: input, shape index: {}]   ;;  %s3451_s8 = inlined_call_operand.vmem [shape: bf16[256,64], index: 8, kind: input, shape index: {}]   ;;  %s3452_s9 = inlined_call_operand.vmem [shape: f32[1,64], index: 9, kind: input, shape index: {}]   ;;  %s3453_s10 = inlined_call_operand.hbm [shape: bf16[64,128], index: 10, kind: input, shape index: {}]   ;;  %s3454_s11 = inlined_call_operand.vmem [shape: f32[1,128], index: 11, kind: input, shape index: {}]   ;;  %s3455_s12 = inlined_call_operand.hbm [shape: f32[2,128], index: 12, kind: output, shape index: {}]  }
   0x1   :  { %18 = vsyncpa [#allocation7], 0 }
   0x2   :  { %19 = vsyncpa [#allocation10], 0 }
   0x3   :  { %20 = vsyncpa [#allocation5], 0  ;;  %s3107_s21 = smov [#allocation6]  }
   0x4   :  { %s38_s22 = sshll.u32 %s3107_s21, 4  ;;  %s39_s22 = int_to_ptr.vmem [resolvable:$true] %s38_s22 }
   0x5   :  { %s2987_s23 = scalar_lea.vmem %s39_s22, 4096  ;;  %p2992_p1 = scmp.lt.s32.totalorder %s39_s22, %s39_s22 }
   0x6   :  { %p2988_p0 = scmp.ne.s32.totalorder %s39_s22, %s2987_s23  ;;  %p2993_p2 = scmp.lt.s32.totalorder %s2987_s23, %s2987_s23 }
   0x8   :  { %p2994_p3 = por %p2993_p2, %p2992_p1 }
   0xa   :  { %p2995_p4 = pnand %p2994_p3, %p2988_p0 }
   0xc   :  { %2998 = shalt.err (!%p2995_p4)
}
   0xd   :  { %s3108_s24 = smov 64   ;;  %s3109_s25 = smov 4  }
   0xe   :  { %44 = dma.hbm_to_vmem [thread:$0]  %s3444_s1, 4096, %s39_s22, [#allocation7], %s3108_s24, %s3108_s24, %s3109_s25  }
   0xf   :  { %s3110_s28 = smov [#allocation9]  }
  0x10   :  { %s68_s29 = sshll.u32 %s3110_s28, 4  ;;  %s69_s29 = int_to_ptr.vmem [resolvable:$true] %s68_s29 }
  0x11   :  { %s3007_s30 = scalar_lea.vmem %s69_s29, 10240  ;;  %p3012_p6 = scmp.lt.s32.totalorder %s69_s29, %s69_s29 }
  0x12   :  { %p3008_p5 = scmp.ne.s32.totalorder %s69_s29, %s3007_s30  ;;  %p3013_p7 = scmp.lt.s32.totalorder %s3007_s30, %s3007_s30 }
  0x14   :  { %p3014_p8 = por %p3013_p7, %p3012_p6 }
  0x16   :  { %p3015_p9 = pnand %p3014_p8, %p3008_p5 }
  0x18   :  { %3018 = shalt.err (!%p3015_p9)
}
  0x19   :  { %s3111_s13 = smov 128   ;;  %s3112_s14 = smov 8  }
  0x1a   :  { %74 = dma.hbm_to_vmem [thread:$0]  %s3449_s6, 10240, %s69_s29, [#allocation10], %s3111_s13, %s3111_s13, %s3112_s14  }
  0x1b   :  { %s3113_s17 = smov [#allocation3]  }
  0x1c   :  { %s26_s18 = sshll.u32 %s3113_s17, 4  ;;  %s27_s18 = int_to_ptr.vmem [resolvable:$true] %s26_s18 }
  0x1d   :  { %s3027_s1 = scalar_lea.vmem %s27_s18, 768  ;;  %p3032_p11 = scmp.lt.s32.totalorder %s27_s18, %s27_s18 }
  0x1e   :  { %p3028_p10 = scmp.ne.s32.totalorder %s27_s18, %s3027_s1  ;;  %p3033_p12 = scmp.lt.s32.totalorder %s3027_s1, %s3027_s1 }
  0x20   :  { %p3034_p13 = por %p3033_p12, %p3032_p11 }
  0x22   :  { %p3035_p0 = pnand %p3034_p13, %p3028_p10 }
  0x24   :  { %3038 = shalt.err (!%p3035_p0)
}
  0x25   :  { %s3114_s19 = smov 256   ;;  %s3115_s20 = smov 16  }
  0x26   :  { %32 = dma.hbm_to_vmem [thread:$0]  %s3443_s0, 768, %s27_s18, [#allocation4], %s3114_s19, %s3114_s19, %s3115_s20  }
  0x27   :  { %s3116_s23 = smov [#allocation8]   ;;  %s3117_s6 = smov [#allocation11]  }
  0x28   :  { %s54_s26 = sshll.u32 %s3116_s23, 4  ;;  %s86_s27 = sshll.u32 %s3117_s6, 4  ;;  %s55_s26 = int_to_ptr.vmem [resolvable:$true] %s54_s26  ;;  %s87_s27 = int_to_ptr.vmem [resolvable:$true] %s86_s27 }
  0x29   :  { %s3047_s28 = scalar_lea.vmem %s55_s26, 3072  ;;  %p3052_p2 = scmp.lt.s32.totalorder %s55_s26, %s55_s26 }
  0x2a   :  { %p3048_p1 = scmp.ne.s32.totalorder %s55_s26, %s3047_s28  ;;  %p3053_p3 = scmp.lt.s32.totalorder %s3047_s28, %s3047_s28 }
  0x2c   :  { %p3054_p4 = por %p3053_p3, %p3052_p2 }
  0x2e   :  { %p3055_p5 = pnand %p3054_p4, %p3048_p1 }
  0x30   :  { %3058 = shalt.err (!%p3055_p5)
}
  0x31   :  { %60 = dma.hbm_to_vmem [thread:$0]  %s3447_s4, 3072, %s55_s26, [#allocation7], %s3108_s24, %s3108_s24, %s3109_s25  }
  0x32   :  { %s3067_s0 = scalar_lea.vmem %s87_s27, 512  ;;  %p3072_p7 = scmp.lt.s32.totalorder %s87_s27, %s87_s27 }
  0x33   :  { %p3068_p6 = scmp.ne.s32.totalorder %s87_s27, %s3067_s0  ;;  %p3073_p8 = scmp.lt.s32.totalorder %s3067_s0, %s3067_s0 }
  0x35   :  { %p3074_p9 = por %p3073_p8, %p3072_p7 }
  0x37   :  { %p3075_p10 = pnand %p3074_p9, %p3068_p6 }
  0x39   :  { %3078 = shalt.err (!%p3075_p10)
}
  0x3a   :  { %92 = dma.hbm_to_vmem [thread:$0]  %s3453_s10, 512, %s87_s27, [#allocation10], %s3108_s24, %s3108_s24, %s3109_s25  }
  0x3b   :  { %3099 = dma.done.wait [#allocation4], 768  }
  0x3c   :  { %3100 = vsyncadd [#allocation4], 4294966528 }
  0x3d   :  { %3101 = dma.done.wait [#allocation7], 7168  }
  0x3e   :  { %3102 = vsyncadd [#allocation7], 4294960128 }
  0x3f   :  { %3103 = dma.done.wait [#allocation10], 10752  }
  0x40   :  { %3104 = vsyncadd [#allocation10], 4294956544  ;;  %v2727_v0 = vld [vmem:[#allocation6 + $0x78] sm:$0xff]   ;;  %v2731_v4 = vld [vmem:[#allocation6 + $0x70] sm:$0xff]   ;;  %v3118_v43 = vmov 0.0   ;;  %vm3119_vm0 = vmmov 0  }
  0x41   :  { %v2728_v1 = vld [vmem:[#allocation6 + $0xf8] sm:$0xff]   ;;  %2443 = vmatprep.subr.bf16.mxu0 %v2727_v0  ;;  %v2732_v5 = vld [vmem:[#allocation6 + $0xf0] sm:$0xff]   ;;  %v2735_v8 = vld [vmem:[#allocation6 + $0x68] sm:$0xff]   ;;  %v3120_v57 = vmov 0   ;;  %vm515_vm1 = vcmask 1045504   ;;  %vm2150_vm2 = vcmask 523264  }
  0x42   :  { %v2729_v2 = vld [vmem:[#allocation6 + $0x38] sm:$0xff]   ;;  %2471 = vmatprep.subr.bf16.mxu1 %v2728_v1  ;;  %v2733_v6 = vld [vmem:[#allocation6 + $0x30] sm:$0xff]   ;;  %v2736_v9 = vld [vmem:[#allocation6 + $0xe8] sm:$0xff]   ;;  %524 = vst [vmem:[#allocation2] sm:$0xf] %v3120_v57  ;;  %s3121_s22 = smov [#allocation12]  }
  0x43   :  { %v2730_v3 = vld [vmem:[#allocation6 + $0xb8] sm:$0xff]   ;;  %2444 = vmatpush3.bf16.msra.mxu0 %v2729_v2  ;;  %v2734_v7 = vld [vmem:[#allocation6 + $0xb0] sm:$0xff]   ;;  %v2737_v10 = vld [vmem:[#allocation6 + $0x28] sm:$0xff]   ;;  %525 = vst [vmem:[#allocation2 + $0x8] sm:$0xe] %v3120_v57  ;;  %s2201_s23 = sshll.u32 %s3121_s22, 4  ;;  %s2202_s23 = int_to_ptr.vmem [resolvable:$true] %s2201_s23 }
  0x44   :  { %2472 = vmatpush3.bf16.msra.mxu1 %v2730_v3  ;;  %2445 = vmatprep.subr.bf16.mxu0 %v2731_v4  ;;  %v2738_v11 = vld [vmem:[#allocation6 + $0xa8] sm:$0xff]   ;;  %v2739_v12 = vld [vmem:[#allocation6 + $0x60] sm:$0xff]   ;;  %v2743_v16 = vld [vmem:[#allocation6 + $0x58] sm:$0xff]   ;;  %p3084_p12 = scmp.lt.s32.totalorder %s2202_s23, %s2202_s23 }
  0x45   :  { %2473 = vmatprep.subr.bf16.mxu1 %v2732_v5  ;;  %v2740_v13 = vld [vmem:[#allocation6 + $0xe0] sm:$0xff]   ;;  %v2744_v17 = vld [vmem:[#allocation6 + $0xd8] sm:$0xff]   ;;  %v2747_v20 = vld [vmem:[#allocation6 + $0x50] sm:$0xff]  }
  0x46   :  { %v2741_v14 = vld [vmem:[#allocation6 + $0x20] sm:$0xff]   ;;  %v2745_v18 = vld [vmem:[#allocation6 + $0x18] sm:$0xff]   ;;  %v2748_v21 = vld [vmem:[#allocation6 + $0xd0] sm:$0xff]  }
  0x47   :  { %2446 = vmatpush3.bf16.msra.mxu0 %v2733_v6  ;;  %v2742_v15 = vld [vmem:[#allocation6 + $0xa0] sm:$0xff]   ;;  %v2746_v19 = vld [vmem:[#allocation6 + $0x98] sm:$0xff]   ;;  %v2749_v22 = vld [vmem:[#allocation6 + $0x10] sm:$0xff]  }
  0x48   :  { %2474 = vmatpush3.bf16.msra.mxu1 %v2734_v7  ;;  %2447 = vmatprep.subr.bf16.mxu0 %v2735_v8  ;;  %v2750_v23 = vld [vmem:[#allocation6 + $0x90] sm:$0xff]   ;;  %v2751_v24 = vld [vmem:[#allocation6 + $0x48] sm:$0xff]   ;;  %v2755_v28 = vld [vmem:[#allocation6 + $0x40] sm:$0xff]  }
  0x49   :  { %2475 = vmatprep.subr.bf16.mxu1 %v2736_v9  ;;  %v2752_v25 = vld [vmem:[#allocation6 + $0xc8] sm:$0xff]   ;;  %v2756_v29 = vld [vmem:[#allocation6 + $0xc0] sm:$0xff]   ;;  %v115_v36 = vld [vmem:[#allocation3 + $0x20] sm:$0x33] }
  0x4a   :  { %v2753_v26 = vld [vmem:[#allocation6 + $0x8] sm:$0xff]   ;;  %v2757_v30 = vld [vmem:[#allocation6] sm:$0xff]   ;;  %v2218_v37 = vcombine.high %v115_v36, %v115_v36  ;;  %v116_v38 = vld [vmem:[#allocation3 + $0x28] sm:$0x33]  ;;  %v2217_v40 = vcombine.low %v115_v36, %v115_v36 }
  0x4b   :  { %2448 = vmatpush3.bf16.msra.mxu0 %v2737_v10  ;;  %v2754_v27 = vld [vmem:[#allocation6 + $0x88] sm:$0xff]   ;;  %v2758_v31 = vld [vmem:[#allocation6 + $0x80] sm:$0xff]   ;;  %v2220_v39 = vcombine.high %v116_v38, %v116_v38  ;;  %v2219_v41 = vcombine.low %v116_v38, %v116_v38  ;;  %v2769_v42 = vld [vmem:[%s3446_s3 + $0x78] sm:$0xff]  }
  0x4c   :  { %2476 = vmatpush3.bf16.msra.mxu1 %v2738_v11  ;;  %2449 = vmatprep.subr.bf16.mxu0 %v2739_v12  ;;  %v2759_v32 = vld [vmem:[#allocation3] ss:$16 sps:$4 sm:$0xff]   ;;  %v2761_v33 = vld [vmem:[#allocation3 + $0x4] ss:$16 sps:$4 sm:$0xff]   ;;  %v2762_v34 = vld [vmem:[#allocation3 + $0x8] ss:$16 sps:$4 sm:$0xff]  }
  0x4d   :  { %2477 = vmatprep.subr.bf16.mxu1 %v2740_v13  ;;  %v2764_v35 = vld [vmem:[#allocation3 + $0xc] ss:$16 sps:$4 sm:$0xff]   ;;  %446 = vmatprep.mubr.bf16.mxu0 %v2761_v33  ;;  %v2770_v44 = vld [vmem:[%s3446_s3 + $0x70] sm:$0xff]   ;;  %v2772_v47 = vld [vmem:[%s3446_s3 + $0x60] sm:$0xff]  }
  0x4e   :  { %494 = vmatprep.mubr.bf16.mxu1 %v2764_v35  ;;  %v2771_v45 = vld [vmem:[%s3446_s3 + $0x68] sm:$0xff]   ;;  %v2773_v46 = vld [vmem:[%s3446_s3 + $0x38] sm:$0xff]   ;;  %v2775_v48 = vld [vmem:[%s3446_s3 + $0x30] sm:$0xff]  }
  0x4f   :  { %2450 = vmatpush3.bf16.msra.mxu0 %v2741_v14  ;;  %v2774_v49 = vld [vmem:[%s3446_s3 + $0x58] sm:$0xff]   ;;  %v2777_v50 = vld [vmem:[%s3446_s3 + $0x28] sm:$0xff]   ;;  %v2776_v51 = vld [vmem:[%s3446_s3 + $0x50] sm:$0xff]  }
  0x50   :  { %2478 = vmatpush3.bf16.msra.mxu1 %v2742_v15  ;;  %2451 = vmatprep.subr.bf16.mxu0 %v2743_v16  ;;  %v2779_v52 = vld [vmem:[%s3446_s3 + $0x20] sm:$0xff]   ;;  %v2778_v53 = vld [vmem:[%s3446_s3 + $0x48] sm:$0xff]   ;;  %v2781_v54 = vld [vmem:[%s3446_s3 + $0x18] sm:$0xff]  }
  0x51   :  { %2479 = vmatprep.subr.bf16.mxu1 %v2744_v17  ;;  %v2780_v55 = vld [vmem:[%s3446_s3 + $0x40] sm:$0xff]   ;;  %v2782_v56 = vld [vmem:[%s3446_s3 + $0x10] sm:$0xff]   ;;  %v2784_v58 = vld [vmem:[%s3446_s3 + $0x8] sm:$0xff]  }
  0x52   :  { %v2786_v59 = vld [vmem:[%s3446_s3] sm:$0xff]   ;;  %v2787_v38 = vld [vmem:[%s3446_s3 + $0xa8] sm:$0xff]  }
  0x53   :  { %2452 = vmatpush3.bf16.msra.mxu0 %v2745_v18  ;;  %v2212_v5 = vld [vmem:[%s3445_s2] ss:$0 sm:$0xff] }
  0x54   :  { %2480 = vmatpush3.bf16.msra.mxu1 %v2746_v19  ;;  %2453 = vmatprep.subr.bf16.mxu0 %v2747_v20 }
  0x55   :  { %2481 = vmatprep.subr.bf16.mxu1 %v2748_v21 }
  0x57   :  { %2454 = vmatpush3.bf16.msra.mxu0 %v2749_v22 }
  0x58   :  { %2482 = vmatpush3.bf16.msra.mxu1 %v2750_v23  ;;  %2455 = vmatprep.subr.bf16.mxu0 %v2751_v24 }
  0x59   :  { %2483 = vmatprep.subr.bf16.mxu1 %v2752_v25 }
  0x5b   :  { %2456 = vmatpush3.bf16.msra.mxu0 %v2753_v26 }
  0x5c   :  { %2484 = vmatpush3.bf16.msra.mxu1 %v2754_v27  ;;  %2457 = vmatprep.subr.bf16.mxu0 %v2755_v28 }
  0x5d   :  { %2485 = vmatprep.subr.bf16.mxu1 %v2756_v29 }
  0x5f   :  { %2458 = vmatpush3.bf16.msra.mxu0 %v2757_v30 }
  0x60   :  { %2486 = vmatpush3.bf16.msra.mxu1 %v2758_v31  ;;  %2580 = vmatprep.subr.bf16.mxu0 %v3118_v43 }
  0x61   :  { %2600 = vmatprep.subr.bf16.mxu1 %v3118_v43 }
  0x62   :  { %447 = vmatmul.mubr.bf16.vlgmr.msra.gmra.mxu0 %v2759_v32 }
  0x63   :  { %495 = vmatmul.mubr.bf16.vlgmr.msra.gmra.mxu1 %v2762_v34  ;;  %454 = vmatprep.mubr.bf16.mxu0 %v2218_v37  ;;  %v2783_v34 = vld [vmem:[%s3446_s3 + $0xb8] sm:$0xff]   ;;  %v2785_v37 = vld [vmem:[%s3446_s3 + $0xb0] sm:$0xff]  }
  0x64   :  { %502 = vmatprep.mubr.bf16.mxu1 %v2220_v39  ;;  %2581 = vmatpush3.bf16.msra.mxu0 %v2769_v42  ;;  %v2789_v42 = vld [vmem:[%s3446_s3 + $0xa0] sm:$0xff]  }
  0x65   :  { %2582 = vmatprep.subr.bf16.mxu0 %v3118_v43  ;;  %2601 = vmatpush3.bf16.msra.mxu1 %v2773_v46  ;;  %v2794_v46 = vld [vmem:[#allocation8 + $0x68] sm:$0xff]  }
  0x66   :  { %2602 = vmatprep.subr.bf16.mxu1 %v3118_v43 }
  0x68   :  { %2583 = vmatpush3.bf16.msra.mxu0 %v2770_v44  ;;  %v2792_v44 = vld [vmem:[#allocation8 + $0x70] sm:$0xff]  }
  0x69   :  { %2584 = vmatprep.subr.bf16.mxu0 %v3118_v43  ;;  %2603 = vmatpush3.bf16.msra.mxu1 %v2775_v48  ;;  %v2796_v48 = vld [vmem:[#allocation8 + $0x60] sm:$0xff]  }
  0x6a   :  { %455 = vmatmul.mubr.bf16.gmra.mxu0 %v2217_v40  ;;  %2604 = vmatprep.subr.bf16.mxu1 %v3118_v43  ;;  %v2790_v40 = vld [vmem:[#allocation8 + $0x78] sm:$0xff]  }
  0x6b   :  { %503 = vmatmul.mubr.bf16.gmra.mxu1 %v2219_v41  ;;  %2596 = vmatprep.mubr.msk.bf16.mxu0 %vm3119_vm0, %v3118_v43 }
  0x6c   :  { %2585 = vmatpush3.bf16.msra.mxu0 %v2771_v45  ;;  %2616 = vmatprep.mubr.msk.bf16.mxu1 %vm3119_vm0, %v3118_v43  ;;  %v2791_v45 = vld [vmem:[%s3446_s3 + $0x98] sm:$0xff]  }
  0x6d   :  { %2586 = vmatprep.subr.bf16.mxu0 %v3118_v43  ;;  %2605 = vmatpush3.bf16.msra.mxu1 %v2777_v50  ;;  %v2798_v50 = vld [vmem:[#allocation8 + $0x58] sm:$0xff]  }
  0x6e   :  { %2606 = vmatprep.subr.bf16.mxu1 %v3118_v43 }
  0x70   :  { %2587 = vmatpush3.bf16.msra.mxu0 %v2772_v47  ;;  %v2793_v47 = vld [vmem:[%s3446_s3 + $0x90] sm:$0xff]  }
  0x71   :  { %2588 = vmatprep.subr.bf16.mxu0 %v3118_v43  ;;  %2607 = vmatpush3.bf16.msra.mxu1 %v2779_v52 }
  0x72   :  { %2608 = vmatprep.subr.bf16.mxu1 %v3118_v43 }
  0x74   :  { %2589 = vmatpush3.bf16.msra.mxu0 %v2774_v49  ;;  %v2795_v49 = vld [vmem:[%s3446_s3 + $0x88] sm:$0xff]  }
  0x75   :  { %2590 = vmatprep.subr.bf16.mxu0 %v3118_v43  ;;  %2609 = vmatpush3.bf16.msra.mxu1 %v2781_v54  ;;  %v2801_v54 = vld [vmem:[#allocation8 + $0x38] sm:$0xff]  }
  0x76   :  { %2610 = vmatprep.subr.bf16.mxu1 %v3118_v43 }
  0x78   :  { %2591 = vmatpush3.bf16.msra.mxu0 %v2776_v51  ;;  %v2797_v51 = vld [vmem:[%s3446_s3 + $0x80] sm:$0xff]  }
  0x79   :  { %2592 = vmatprep.subr.bf16.mxu0 %v3118_v43  ;;  %2611 = vmatpush3.bf16.msra.mxu1 %v2782_v56  ;;  %v2802_v56 = vld [vmem:[#allocation8 + $0x48] sm:$0xff]  }
  0x7a   :  { %2612 = vmatprep.subr.bf16.mxu1 %v3118_v43 }
  0x7c   :  { %2593 = vmatpush3.bf16.msra.mxu0 %v2778_v53  ;;  %v2800_v53 = vld [vmem:[#allocation8 + $0x50] sm:$0xff]  }
  0x7d   :  { %2594 = vmatprep.subr.bf16.mxu0 %v3118_v43  ;;  %2613 = vmatpush3.bf16.msra.mxu1 %v2784_v58  ;;  %v2803_v58 = vld [vmem:[#allocation8 + $0x30] sm:$0xff]  }
  0x7e   :  { %2614 = vmatprep.subr.bf16.mxu1 %v3118_v43 }
  0x80   :  { %2595 = vmatpush3.bf16.msra.mxu0 %v2780_v55 }
  0x81   :  { %2620 = vmatprep.subr.bf16.mxu0 %v3118_v43  ;;  %2615 = vmatpush3.bf16.msra.mxu1 %v2786_v59  ;;  %v2804_v59 = vld [vmem:[#allocation8 + $0x40] sm:$0xff]  }
  0x82   :  { %2640 = vmatprep.subr.bf16.mxu1 %v3118_v43 }
 0x122   :  { %v2459_v60 = vpop.f32.mrf.mxu0 }
 0x123   :  { %v2487_v61 = vpop.f32.mrf.mxu1 }
 0x124   :  { %v2460_v62 = vpop.f32.mrf.mxu0 }
 0x125   :  { %v2488_v63 = vpop.f32.mrf.mxu1  ;;  %v2461_v6 = vadd.f32 %v2460_v62, %v2459_v60  ;;  %v2805_v60 = vld [vmem:[#allocation8 + $0x28] sm:$0xff]   ;;  %v2806_v62 = vld [vmem:[#allocation8 + $0x20] sm:$0xff]  }
 0x126   :  { %v2462_v0 = vpop.f32.mrf.mxu0  ;;  %v2489_v20 = vadd.f32 %v2488_v63, %v2487_v61  ;;  %v2807_v61 = vld [vmem:[#allocation8 + $0xb8] sm:$0xff]   ;;  %v2809_v63 = vld [vmem:[#allocation8 + $0xb0] sm:$0xff]  }
 0x127   :  { %v2490_v1 = vpop.f32.mrf.mxu1  ;;  %v449_v15 = vadd.f32 %v2461_v6, %v2212_v5  ;;  %v2814_v6 = vld [vmem:[#allocation8] sm:$0xff]  }
 0x128   :  { %v2463_v2 = vpop.f32.mrf.mxu0 }
 0x129   :  { %v2464_v3 = vadd.f32 %v2463_v2, %v2462_v0  ;;  %v2491_v4 = vpop.f32.mrf.mxu1  ;;  %v497_v24 = vadd.f32 %v2489_v20, %v449_v15  ;;  %v2808_v0 = vld [vmem:[#allocation8 + $0x18] sm:$0xff]   ;;  %v2810_v2 = vld [vmem:[#allocation8 + $0x10] sm:$0xff]   ;;  %v2827_v15 = vld [vmem:[#allocation9 + $0x64] ss:$8 sps:$4 sm:$0xff]  }
 0x12a   :  { %v2465_v7 = vpop.f32.mrf.mxu0  ;;  %v2492_v9 = vadd.f32 %v2491_v4, %v2490_v1  ;;  %v2811_v1 = vld [vmem:[#allocation8 + $0xa8] sm:$0xff]   ;;  %v2836_v20 = vld [vmem:[#allocation9 + $0xd4] ss:$8 sps:$4 sm:$0xff]  }
 0x12b   :  { %v452_v8 = vadd.f32 %v2464_v3, %v2212_v5  ;;  %v2493_v10 = vpop.f32.mrf.mxu1  ;;  %v2813_v3 = vld [vmem:[#allocation8 + $0xa0] sm:$0xff]   ;;  %v2812_v4 = vld [vmem:[#allocation8 + $0x8] sm:$0xff]  }
 0x12c   :  { %v2466_v11 = vpop.f32.mrf.mxu0 }
 0x12d   :  { %v500_v12 = vadd.f32 %v2492_v9, %v452_v8  ;;  %v2467_v13 = vadd.f32 %v2466_v11, %v2465_v7  ;;  %v2494_v14 = vpop.f32.mrf.mxu1  ;;  %v2816_v7 = vld [vmem:[#allocation8 + $0x90] sm:$0xff]   ;;  %v2817_v8 = vld [vmem:[#allocation8 + $0x88] sm:$0xff]   ;;  %v2818_v9 = vld [vmem:[#allocation8 + $0x80] sm:$0xff]  }
 0x12e   :  { %v2468_v16 = vpop.f32.mrf.mxu0  ;;  %v2495_v18 = vadd.f32 %v2494_v14, %v2493_v10  ;;  %v2821_v10 = vld [vmem:[#allocation9 + $0x74] ss:$8 sps:$4 sm:$0xff]   ;;  %v2819_v11 = vld [vmem:[#allocation9 + $0x70] ss:$8 sps:$4 sm:$0xff]   ;;  %v2825_v14 = vld [vmem:[#allocation9 + $0x60] ss:$8 sps:$4 sm:$0xff]  }
 0x12f   :  { %v457_v17 = vadd.f32 %v2467_v13, %v2212_v5  ;;  %v2496_v19 = vpop.f32.mrf.mxu1  ;;  %2959 = vtanh.f32 %v500_v12  ;;  %v2815_v5 = vld [vmem:[#allocation8 + $0x98] sm:$0xff]   ;;  %v2830_v16 = vld [vmem:[#allocation9 + $0xe4] ss:$8 sps:$4 sm:$0xff]  }
 0x130   :  { %v2469_v21 = vpop.f32.mrf.mxu0  ;;  %v2824_v12 = vld [vmem:[#allocation9 + $0xf4] ss:$8 sps:$4 sm:$0xff]   ;;  %v2822_v13 = vld [vmem:[#allocation9 + $0xf0] ss:$8 sps:$4 sm:$0xff]  }
 0x131   :  { %v505_v22 = vadd.f32 %v2495_v18, %v457_v17  ;;  %v2497_v23 = vpop.f32.mrf.mxu1  ;;  %v2828_v17 = vld [vmem:[#allocation9 + $0xe0] ss:$8 sps:$4 sm:$0xff]   ;;  %v2833_v18 = vld [vmem:[#allocation9 + $0x54] ss:$8 sps:$4 sm:$0xff]   ;;  %v2831_v19 = vld [vmem:[#allocation9 + $0x50] ss:$8 sps:$4 sm:$0xff]  }
 0x132   :  { %v2834_v21 = vld [vmem:[#allocation9 + $0xd0] ss:$8 sps:$4 sm:$0xff]   ;;  %v2837_v23 = vld [vmem:[#allocation9 + $0x40] ss:$8 sps:$4 sm:$0xff]  }
 0x133   :  { %2961 = vtanh.f32 %v505_v22  ;;  %v2839_v22 = vld [vmem:[#allocation9 + $0x44] ss:$8 sps:$4 sm:$0xff]  }
 0x134   :  { %2963 = vtanh.f32 %v497_v24  ;;  %v2842_v24 = vld [vmem:[#allocation9 + $0xc4] ss:$8 sps:$4 sm:$0xff]  }
 0x13c   :  { %v2960_v25 = vpop.eup %2959 }
 0x13d   :  { %v516_v27 = vrot.slane %v2960_v25, 2 }
 0x140   :  { %v2962_v26 = vpop.eup %2961 }
 0x141   :  { %v517_v28 = vrot.slane %v2962_v26, 2  ;;  %v2964_v29 = vpop.eup %2963  ;;  %v2845_v26 = vld [vmem:[#allocation9 + $0x34] ss:$8 sps:$4 sm:$0xff]  }
 0x143   :  { %v518_v30 = vsel %vm515_vm1, %v516_v27, %v517_v28  ;;  %v522_v31 = vmax.f32 %v2960_v25, %v517_v28  ;;  %v2840_v25 = vld [vmem:[#allocation9 + $0xc0] ss:$8 sps:$4 sm:$0xff]   ;;  %v2843_v27 = vld [vmem:[#allocation9 + $0x30] ss:$8 sps:$4 sm:$0xff]  }
 0x144   :  { %v521_v32 = vmax.f32 %v2964_v29, %v518_v30  ;;  %v2846_v28 = vld [vmem:[#allocation9 + $0xb0] ss:$8 sps:$4 sm:$0xff]   ;;  %v2848_v29 = vld [vmem:[#allocation9 + $0xb4] ss:$8 sps:$4 sm:$0xff]   ;;  %v2851_v30 = vld [vmem:[#allocation9 + $0x24] ss:$8 sps:$4 sm:$0xff]  }
 0x145   :  { %v2442_v33 = vpack.c.bf16 %v522_v31, %v522_v31 }
 0x146   :  { %v3289_v35 = vpack.c.bf16 %v522_v31, %v521_v32  ;;  %v2441_v36 = vpack.c.bf16 %v521_v32, %v521_v32  ;;  %v2849_v31 = vld [vmem:[#allocation9 + $0x20] ss:$8 sps:$4 sm:$0xff]   ;;  %v2854_v32 = vld [vmem:[#allocation9 + $0xa4] ss:$8 sps:$4 sm:$0xff]  }
 0x147   :  { %535 = vst [vmem:[#allocation2 + $0x8] sm:$0x1] %v2442_v33  ;;  %v2857_v33 = vld [vmem:[#allocation9 + $0x14] ss:$8 sps:$4 sm:$0xff]  }
 0x148   :  { %534 = vst [vmem:[#allocation2 + $0x4] sm:$0xf] %v2441_v36  ;;  %2597 = vmatmul.mubr.bf16.vlgmr.msra.gmra.mxu0 %v3289_v35  ;;  %v2855_v36 = vld [vmem:[#allocation9 + $0x10] ss:$8 sps:$4 sm:$0xff]  }
 0x149   :  { %2621 = vmatpush3.bf16.msra.mxu0 %v2783_v34  ;;  %2636 = vmatprep.mubr.msk.bf16.mxu0 %vm3119_vm0, %v3118_v43  ;;  %v2852_v34 = vld [vmem:[#allocation9 + $0xa0] ss:$8 sps:$4 sm:$0xff]  }
 0x14a   :  { %2622 = vmatprep.subr.bf16.mxu0 %v3118_v43 }
 0x14d   :  { %2623 = vmatpush3.bf16.msra.mxu0 %v2785_v37  ;;  %v2863_v37 = vld [vmem:[#allocation9 + $0x4] ss:$8 sps:$4 sm:$0xff]  }
 0x14e   :  { %2624 = vmatprep.subr.bf16.mxu0 %v3118_v43 }
 0x14f   :  { %v3302_v39 = vld [vmem:[#allocation2] sm:$0xf8]  }
 0x150   :  { %v668_v41 = vrot.slane %v3302_v39, 3  ;;  %v3333_v52 = vld [vmem:[#allocation2 + $0x4] sm:$0x3e]  }
 0x151   :  { %2625 = vmatpush3.bf16.msra.mxu0 %v2787_v38  ;;  %v781_v55 = vrot.slane %v3333_v52, 1  ;;  %v2858_v38 = vld [vmem:[#allocation9 + $0x90] ss:$8 sps:$4 sm:$0xff]   ;;  %v2866_v39 = vld [vmem:[#allocation9 + $0x84] ss:$8 sps:$4 sm:$0xff]  }
 0x152   :  { %2626 = vmatprep.subr.bf16.mxu0 %v3118_v43  ;;  %2617 = vmatmul.mubr.bf16.vlgmr.msra.gmra.mxu1 %v668_v41 }
 0x153   :  { %2641 = vmatpush3.bf16.msra.mxu1 %v2790_v40  ;;  %2656 = vmatprep.mubr.msk.bf16.mxu1 %vm3119_vm0, %v3118_v43  ;;  %v2861_v40 = vld [vmem:[#allocation9] ss:$8 sps:$4 sm:$0xff]  }
 0x154   :  { %2642 = vmatprep.subr.bf16.mxu1 %v3118_v43 }
 0x155   :  { %2627 = vmatpush3.bf16.msra.mxu0 %v2789_v42  ;;  %v2864_v42 = vld [vmem:[#allocation9 + $0x80] ss:$8 sps:$4 sm:$0xff]  }
 0x156   :  { %2628 = vmatprep.subr.bf16.mxu0 %v3118_v43 }
 0x157   :  { %2643 = vmatpush3.bf16.msra.mxu1 %v2792_v44  ;;  %v2872_v44 = vld [vmem:[#allocation9 + $0x1f4] ss:$8 sps:$4 sm:$0xff]  }
 0x158   :  { %2644 = vmatprep.subr.bf16.mxu1 %v3118_v43 }
 0x159   :  { %2629 = vmatpush3.bf16.msra.mxu0 %v2791_v45 }
 0x15a   :  { %2630 = vmatprep.subr.bf16.mxu0 %v3118_v43 }
 0x15b   :  { %2645 = vmatpush3.bf16.msra.mxu1 %v2794_v46 }
 0x15c   :  { %2646 = vmatprep.subr.bf16.mxu1 %v3118_v43 }
 0x15d   :  { %2631 = vmatpush3.bf16.msra.mxu0 %v2793_v47 }
 0x15e   :  { %2632 = vmatprep.subr.bf16.mxu0 %v3118_v43 }
 0x15f   :  { %2647 = vmatpush3.bf16.msra.mxu1 %v2796_v48 }
 0x160   :  { %2648 = vmatprep.subr.bf16.mxu1 %v3118_v43 }
 0x161   :  { %2633 = vmatpush3.bf16.msra.mxu0 %v2795_v49 }
 0x162   :  { %2634 = vmatprep.subr.bf16.mxu0 %v3118_v43 }
 0x163   :  { %2649 = vmatpush3.bf16.msra.mxu1 %v2798_v50 }
 0x164   :  { %2650 = vmatprep.subr.bf16.mxu1 %v3118_v43 }
 0x165   :  { %2635 = vmatpush3.bf16.msra.mxu0 %v2797_v51 }
 0x166   :  { %2660 = vmatprep.subr.bf16.mxu0 %v3118_v43 }
 0x167   :  { %2651 = vmatpush3.bf16.msra.mxu1 %v2800_v53 }
 0x168   :  { %2637 = vmatmul.mubr.bf16.vlgmr.msra.gmra.mxu0 %v781_v55  ;;  %2652 = vmatprep.subr.bf16.mxu1 %v3118_v43 }
 0x169   :  { %2661 = vmatpush3.bf16.msra.mxu0 %v2801_v54  ;;  %2676 = vmatprep.mubr.msk.bf16.mxu0 %vm3119_vm0, %v3118_v43 }
 0x16a   :  { %2662 = vmatprep.subr.bf16.mxu0 %v3118_v43 }
 0x16b   :  { %2653 = vmatpush3.bf16.msra.mxu1 %v2802_v56 }
 0x16c   :  { %2654 = vmatprep.subr.bf16.mxu1 %v3118_v43 }
 0x16d   :  { %2663 = vmatpush3.bf16.msra.mxu0 %v2803_v58 }
 0x16e   :  { %2664 = vmatprep.subr.bf16.mxu0 %v3118_v43 }
 0x16f   :  { %2655 = vmatpush3.bf16.msra.mxu1 %v2804_v59 }
 0x170   :  { %2680 = vmatprep.subr.bf16.mxu1 %v3118_v43 }
 0x171   :  { %2665 = vmatpush3.bf16.msra.mxu0 %v2805_v60 }
 0x172   :  { %2666 = vmatprep.subr.bf16.mxu0 %v3118_v43  ;;  %2657 = vmatmul.mubr.bf16.vlgmr.msra.gmra.mxu1 %v3289_v35  ;;  %v2860_v35 = vld [vmem:[#allocation9 + $0x94] ss:$8 sps:$4 sm:$0xff]  }
 0x173   :  { %2681 = vmatpush3.bf16.msra.mxu1 %v2807_v61  ;;  %2696 = vmatprep.mubr.msk.bf16.mxu1 %vm3119_vm0, %v3118_v43 }
 0x174   :  { %2682 = vmatprep.subr.bf16.mxu1 %v3118_v43 }
 0x175   :  { %2667 = vmatpush3.bf16.msra.mxu0 %v2806_v62 }
 0x176   :  { %2668 = vmatprep.subr.bf16.mxu0 %v3118_v43 }
 0x177   :  { %2683 = vmatpush3.bf16.msra.mxu1 %v2809_v63 }
 0x178   :  { %2684 = vmatprep.subr.bf16.mxu1 %v3118_v43 }
 0x179   :  { %2669 = vmatpush3.bf16.msra.mxu0 %v2808_v0 }
 0x17a   :  { %2670 = vmatprep.subr.bf16.mxu0 %v3118_v43 }
 0x17b   :  { %2685 = vmatpush3.bf16.msra.mxu1 %v2811_v1 }
 0x17c   :  { %2686 = vmatprep.subr.bf16.mxu1 %v3118_v43 }
 0x17d   :  { %2671 = vmatpush3.bf16.msra.mxu0 %v2810_v2 }
 0x17e   :  { %2672 = vmatprep.subr.bf16.mxu0 %v3118_v43 }
 0x17f   :  { %2687 = vmatpush3.bf16.msra.mxu1 %v2813_v3 }
 0x180   :  { %2688 = vmatprep.subr.bf16.mxu1 %v3118_v43 }
 0x181   :  { %2673 = vmatpush3.bf16.msra.mxu0 %v2812_v4 }
 0x182   :  { %2674 = vmatprep.subr.bf16.mxu0 %v3118_v43 }
 0x183   :  { %2689 = vmatpush3.bf16.msra.mxu1 %v2815_v5  ;;  %v2337_v5 = vld [vmem:[%s3448_s5] ss:$0 sm:$0xff] }
 0x184   :  { %2690 = vmatprep.subr.bf16.mxu1 %v3118_v43 }
 0x185   :  { %2675 = vmatpush3.bf16.msra.mxu0 %v2814_v6 }
 0x186   :  { %1307 = vmatprep.subr.bf16.mxu0 %v2821_v10 }
 0x187   :  { %2691 = vmatpush3.bf16.msra.mxu1 %v2816_v7 }
 0x188   :  { %2677 = vmatmul.mubr.bf16.vlgmr.msra.gmra.mxu0 %v668_v41  ;;  %2692 = vmatprep.subr.bf16.mxu1 %v3118_v43  ;;  %v2869_v41 = vld [vmem:[#allocation9 + $0x174] ss:$8 sps:$4 sm:$0xff]  }
 0x189   :  { %1339 = vmatprep.mubr.bf16.mxu0 %v3120_v57  ;;  %1308 = vmatpush1.bf16.msra.mxu0 %v2819_v11 }
 0x18a   :  { %1309 = vmatprep.subr.bf16.mxu0 %v2827_v15 }
 0x18b   :  { %2693 = vmatpush3.bf16.msra.mxu1 %v2817_v8 }
 0x18c   :  { %2694 = vmatprep.subr.bf16.mxu1 %v3118_v43 }
 0x18d   :  { %1310 = vmatpush1.bf16.msra.mxu0 %v2825_v14 }
 0x18e   :  { %1311 = vmatprep.subr.bf16.mxu0 %v2833_v18 }
 0x18f   :  { %2695 = vmatpush3.bf16.msra.mxu1 %v2818_v9 }
 0x190   :  { %1461 = vmatprep.subr.bf16.mxu1 %v2824_v12 }
 0x191   :  { %1312 = vmatpush1.bf16.msra.mxu0 %v2831_v19 }
 0x192   :  { %2697 = vmatmul.mubr.bf16.vlgmr.msra.gmra.mxu1 %v781_v55  ;;  %1313 = vmatprep.subr.bf16.mxu0 %v2839_v22 }
 0x193   :  { %1493 = vmatprep.mubr.bf16.mxu1 %v3120_v57  ;;  %1462 = vmatpush1.bf16.msra.mxu1 %v2822_v13 }
 0x194   :  { %1463 = vmatprep.subr.bf16.mxu1 %v2830_v16 }
 0x195   :  { %1314 = vmatpush1.bf16.msra.mxu0 %v2837_v23 }
 0x196   :  { %1315 = vmatprep.subr.bf16.mxu0 %v2845_v26 }
 0x197   :  { %1464 = vmatpush1.bf16.msra.mxu1 %v2828_v17 }
 0x198   :  { %1465 = vmatprep.subr.bf16.mxu1 %v2836_v20 }
 0x199   :  { %1316 = vmatpush1.bf16.msra.mxu0 %v2843_v27  ;;  %v2875_v27 = vld [vmem:[#allocation9 + $0x164] ss:$8 sps:$4 sm:$0xff]  }
 0x19a   :  { %1317 = vmatprep.subr.bf16.mxu0 %v2851_v30  ;;  %v2878_v30 = vld [vmem:[#allocation9 + $0x1e4] ss:$8 sps:$4 sm:$0xff]  }
 0x19b   :  { %1466 = vmatpush1.bf16.msra.mxu1 %v2834_v21 }
 0x19c   :  { %1467 = vmatprep.subr.bf16.mxu1 %v2842_v24 }
 0x19d   :  { %1318 = vmatpush1.bf16.msra.mxu0 %v2849_v31  ;;  %v2873_v31 = vld [vmem:[#allocation9 + $0x160] ss:$8 sps:$4 sm:$0xff]  }
 0x19e   :  { %1319 = vmatprep.subr.bf16.mxu0 %v2857_v33  ;;  %v2876_v33 = vld [vmem:[#allocation9 + $0x1e0] ss:$8 sps:$4 sm:$0xff]  }
 0x19f   :  { %1468 = vmatpush1.bf16.msra.mxu1 %v2840_v25  ;;  %v2867_v25 = vld [vmem:[#allocation9 + $0x170] ss:$8 sps:$4 sm:$0xff]  }
 0x1a0   :  { %1469 = vmatprep.subr.bf16.mxu1 %v2848_v29 }
 0x1a1   :  { %1320 = vmatpush1.bf16.msra.mxu0 %v2855_v36  ;;  %v2887_v36 = vld [vmem:[#allocation9 + $0x144] ss:$8 sps:$4 sm:$0xff]  }
 0x1a2   :  { %1321 = vmatprep.subr.bf16.mxu0 %v2863_v37  ;;  %v2882_v37 = vld [vmem:[#allocation9 + $0x1d0] ss:$8 sps:$4 sm:$0xff]  }
 0x1a3   :  { %1470 = vmatpush1.bf16.msra.mxu1 %v2846_v28  ;;  %v2870_v28 = vld [vmem:[#allocation9 + $0x1f0] ss:$8 sps:$4 sm:$0xff]  }
 0x1a4   :  { %1471 = vmatprep.subr.bf16.mxu1 %v2854_v32  ;;  %v2881_v32 = vld [vmem:[#allocation9 + $0x154] ss:$8 sps:$4 sm:$0xff]  }
 0x1a5   :  { %1322 = vmatpush1.bf16.msra.mxu0 %v2861_v40  ;;  %v2893_v40 = vld [vmem:[#allocation9 + $0x134] ss:$8 sps:$4 sm:$0xff]  }
 0x1a6   :  { %1603 = vmatprep.subr.bf16.mxu0 %v2869_v41  ;;  %v2888_v41 = vld [vmem:[#allocation9 + $0x1c0] ss:$8 sps:$4 sm:$0xff]  }
 0x1a7   :  { %1472 = vmatpush1.bf16.msra.mxu1 %v2852_v34  ;;  %v2884_v34 = vld [vmem:[#allocation9 + $0x1d4] ss:$8 sps:$4 sm:$0xff]  }
 0x1a8   :  { %1473 = vmatprep.subr.bf16.mxu1 %v2860_v35  ;;  %v2879_v35 = vld [vmem:[#allocation9 + $0x150] ss:$8 sps:$4 sm:$0xff]  }
 0x1ab   :  { %1474 = vmatpush1.bf16.msra.mxu1 %v2858_v38  ;;  %v2890_v38 = vld [vmem:[#allocation9 + $0x1c4] ss:$8 sps:$4 sm:$0xff]  }
 0x1ac   :  { %1475 = vmatprep.subr.bf16.mxu1 %v2866_v39  ;;  %v2885_v39 = vld [vmem:[#allocation9 + $0x140] ss:$8 sps:$4 sm:$0xff]  }
 0x1af   :  { %1476 = vmatpush1.bf16.msra.mxu1 %v2864_v42  ;;  %v2896_v42 = vld [vmem:[#allocation9 + $0x1b4] ss:$8 sps:$4 sm:$0xff]  }
 0x1b0   :  { %1745 = vmatprep.subr.bf16.mxu1 %v2872_v44  ;;  %v2891_v44 = vld [vmem:[#allocation9 + $0x130] ss:$8 sps:$4 sm:$0xff]  }
 0x208   :  { %v656_v45 = vpop.f32.mrf.mxu0 }
 0x20a   :  { %v2598_v46 = vpop.f32.mrf.mxu0 }
 0x20b   :  { %v2894_v46 = vld [vmem:[#allocation9 + $0x1b0] ss:$8 sps:$4 sm:$0xff]  }
 0x20c   :  { %v659_v47 = vpop.f32.mrf.mxu0 }
 0x20e   :  { %v2599_v48 = vpop.f32.mrf.mxu0 }
 0x20f   :  { %v2897_v48 = vld [vmem:[#allocation9 + $0x120] ss:$8 sps:$4 sm:$0xff]  }
 0x212   :  { %v752_v49 = vpop.f32.mrf.mxu1 }
 0x213   :  { %v753_v50 = vadd.f32 %v752_v49, %v656_v45  ;;  %v2899_v45 = vld [vmem:[#allocation9 + $0x124] ss:$8 sps:$4 sm:$0xff]   ;;  %v2905_v49 = vld [vmem:[#allocation9 + $0x114] ss:$8 sps:$4 sm:$0xff]  }
 0x214   :  { %v2618_v51 = vpop.f32.mrf.mxu1 }
 0x215   :  { %v2908_v51 = vld [vmem:[#allocation9 + $0x194] ss:$8 sps:$4 sm:$0xff]  }
 0x216   :  { %v755_v52 = vpop.f32.mrf.mxu1 }
 0x217   :  { %v756_v3 = vadd.f32 %v755_v52, %v659_v47  ;;  %v2902_v47 = vld [vmem:[#allocation9 + $0x1a4] ss:$8 sps:$4 sm:$0xff]   ;;  %v2903_v52 = vld [vmem:[#allocation9 + $0x110] ss:$8 sps:$4 sm:$0xff]  }
 0x218   :  { %v2619_v53 = vpop.f32.mrf.mxu1 }
 0x219   :  { %v2911_v53 = vld [vmem:[#allocation9 + $0x104] ss:$8 sps:$4 sm:$0xff]  }
 0x228   :  { %v865_v54 = vpop.f32.mrf.mxu0 }
 0x229   :  { %v872_v4 = vadd.f32 %v865_v54, %v753_v50  ;;  %v2900_v50 = vld [vmem:[#allocation9 + $0x1a0] ss:$8 sps:$4 sm:$0xff]   ;;  %v2906_v54 = vld [vmem:[#allocation9 + $0x190] ss:$8 sps:$4 sm:$0xff]  }
 0x22a   :  { %v2638_v55 = vpop.f32.mrf.mxu0 }
 0x22b   :  { %v1199_v10 = vadd.f32 %v2337_v5, %v872_v4  ;;  %v2914_v55 = vld [vmem:[#allocation9 + $0x184] ss:$8 sps:$4 sm:$0xff]   ;;  %v2924_v4 = vld [vmem:[#allocation9 + $0x240] ss:$8 sps:$4 sm:$0xff]  }
 0x22c   :  { %v868_v56 = vpop.f32.mrf.mxu0 }
 0x22d   :  { %v873_v7 = vadd.f32 %v868_v56, %v756_v3  ;;  %2965 = vtanh.f32 %v1199_v10  ;;  %v2909_v56 = vld [vmem:[#allocation9 + $0x100] ss:$8 sps:$4 sm:$0xff]   ;;  %v2926_v3 = vld [vmem:[#allocation9 + $0x244] ss:$8 sps:$4 sm:$0xff]  }
 0x22e   :  { %v2639_v58 = vpop.f32.mrf.mxu0  ;;  %v2938_v10 = vld [vmem:[#allocation9 + $0x204] ss:$8 sps:$4 sm:$0xff]  }
 0x22f   :  { %v1200_v14 = vadd.f32 %v2337_v5, %v873_v7  ;;  %v2917_v58 = vld [vmem:[#allocation9 + $0x274] ss:$8 sps:$4 sm:$0xff]   ;;  %v2932_v7 = vld [vmem:[#allocation9 + $0x224] ss:$8 sps:$4 sm:$0xff]  }
 0x232   :  { %v989_v59 = vpop.f32.mrf.mxu1 }
 0x234   :  { %v2658_v60 = vpop.f32.mrf.mxu1 }
 0x235   :  { %v2915_v60 = vld [vmem:[#allocation9 + $0x270] ss:$8 sps:$4 sm:$0xff]  }
 0x236   :  { %v992_v61 = vpop.f32.mrf.mxu1 }
 0x238   :  { %v2659_v62 = vpop.f32.mrf.mxu1 }
 0x239   :  { %v2920_v62 = vld [vmem:[#allocation9 + $0x264] ss:$8 sps:$4 sm:$0xff]  }
 0x23a   :  { %v2966_v19 = vpop.eup %2965 }
 0x248   :  { %v1078_v63 = vpop.f32.mrf.mxu0 }
 0x249   :  { %v1079_v6 = vadd.f32 %v1078_v63, %v989_v59  ;;  %v2912_v59 = vld [vmem:[#allocation9 + $0x180] ss:$8 sps:$4 sm:$0xff]  }
 0x24a   :  { %v2678_v0 = vpop.f32.mrf.mxu0 }
 0x24b   :  { %v2918_v0 = vld [vmem:[#allocation9 + $0x260] ss:$8 sps:$4 sm:$0xff]  }
 0x24c   :  { %v1081_v1 = vpop.f32.mrf.mxu0 }
 0x24d   :  { %v1082_v12 = vadd.f32 %v1081_v1, %v992_v61  ;;  %v2923_v1 = vld [vmem:[#allocation9 + $0x254] ss:$8 sps:$4 sm:$0xff]  }
 0x24e   :  { %v2679_v2 = vpop.f32.mrf.mxu0 }
 0x24f   :  { %v2921_v2 = vld [vmem:[#allocation9 + $0x250] ss:$8 sps:$4 sm:$0xff]  }
 0x252   :  { %v1184_v8 = vpop.f32.mrf.mxu1 }
 0x253   :  { %v1191_v9 = vadd.f32 %v1184_v8, %v1079_v6  ;;  %v2927_v6 = vld [vmem:[#allocation9 + $0x230] ss:$8 sps:$4 sm:$0xff]   ;;  %v2930_v8 = vld [vmem:[#allocation9 + $0x220] ss:$8 sps:$4 sm:$0xff]  }
 0x254   :  { %v2698_v11 = vpop.f32.mrf.mxu1 }
 0x255   :  { %v1203_v13 = vadd.f32 %v2337_v5, %v1191_v9  ;;  %v2935_v9 = vld [vmem:[#allocation9 + $0x214] ss:$8 sps:$4 sm:$0xff]   ;;  %v2936_v11 = vld [vmem:[#allocation9 + $0x200] ss:$8 sps:$4 sm:$0xff]  }
 0x256   :  { %v1187_v15 = vpop.f32.mrf.mxu1 }
 0x257   :  { %v1192_v16 = vadd.f32 %v1187_v15, %v1082_v12  ;;  %2967 = vtanh.f32 %v1203_v13  ;;  %v2939_v13 = vld [vmem:[%s3451_s8 + $0x78] sm:$0xff]   ;;  %v2941_v15 = vld [vmem:[%s3451_s8 + $0x70] sm:$0xff]  }
 0x258   :  { %v2699_v17 = vpop.f32.mrf.mxu1  ;;  %2969 = vtanh.f32 %v1200_v14  ;;  %v2940_v14 = vld [vmem:[%s3451_s8 + $0x38] sm:$0xff]  }
 0x259   :  { %v1204_v18 = vadd.f32 %v2337_v5, %v1192_v16  ;;  %v2929_v5 = vld [vmem:[#allocation9 + $0x234] ss:$8 sps:$4 sm:$0xff]   ;;  %v2943_v17 = vld [vmem:[%s3451_s8 + $0x68] sm:$0xff]  }
 0x25a   :  { %v2942_v16 = vld [vmem:[%s3451_s8 + $0x30] sm:$0xff]  }
 0x25b   :  { %2971 = vtanh.f32 %v1204_v18  ;;  %v2944_v18 = vld [vmem:[%s3451_s8 + $0x28] sm:$0xff]  }
 0x264   :  { %v2968_v20 = vpop.eup %2967 }
 0x265   :  { %v2970_v21 = vpop.eup %2969  ;;  %v1207_v23 = vmax.f32 %v2966_v19, %v2968_v20  ;;  %v2945_v19 = vld [vmem:[%s3451_s8 + $0x60] sm:$0xff]  }
 0x266   :  { %v2946_v20 = vld [vmem:[%s3451_s8 + $0x20] sm:$0xff]  }
 0x268   :  { %v2972_v22 = vpop.eup %2971 }
 0x269   :  { %v1208_v24 = vmax.f32 %v2970_v21, %v2972_v22  ;;  %v2947_v21 = vld [vmem:[%s3451_s8 + $0x58] sm:$0xff]  }
 0x26a   :  { %v2948_v22 = vld [vmem:[%s3451_s8 + $0x18] sm:$0xff]  }
 0x26b   :  { %v3367_v26 = vpack.c.bf16 %v1208_v24, %v1207_v23  ;;  %v2949_v23 = vld [vmem:[%s3451_s8 + $0x50] sm:$0xff]  }
 0x26c   :  { %v2950_v24 = vld [vmem:[%s3451_s8 + $0x10] sm:$0xff]  }
 0x26d   :  { %1340 = vmatmul.mubr.bf16.vlgmr.msra.gmra.mxu0 %v3367_v26  ;;  %v1379_v29 = vrot.slane %v3367_v26, 1  ;;  %v1521_v61 = vrot.slane %v3367_v26, 2  ;;  %v1663_v63 = vrot.slane %v3367_v26, 3  ;;  %v1805_v12 = vrot.slane %v3367_v26, 4  ;;  %v2952_v26 = vld [vmem:[%s3451_s8 + $0x8] sm:$0xff]  }
 0x26e   :  { %1604 = vmatpush1.bf16.msra.mxu0 %v2867_v25  ;;  %1635 = vmatprep.mubr.bf16.mxu0 %v3120_v57  ;;  %v2951_v25 = vld [vmem:[%s3451_s8 + $0x48] sm:$0xff]  }
 0x26f   :  { %1494 = vmatmul.mubr.bf16.vlgmr.msra.gmra.mxu1 %v1379_v29  ;;  %1605 = vmatprep.subr.bf16.mxu0 %v2875_v27  ;;  %v2953_v27 = vld [vmem:[%s3451_s8 + $0x40] sm:$0xff]  }
 0x270   :  { %1746 = vmatpush1.bf16.msra.mxu1 %v2870_v28  ;;  %1777 = vmatprep.mubr.bf16.mxu1 %v3120_v57  ;;  %v2954_v28 = vld [vmem:[%s3451_s8] sm:$0xff]  }
 0x271   :  { %1747 = vmatprep.subr.bf16.mxu1 %v2878_v30 }
 0x272   :  { %1606 = vmatpush1.bf16.msra.mxu0 %v2873_v31 }
 0x273   :  { %1607 = vmatprep.subr.bf16.mxu0 %v2881_v32 }
 0x274   :  { %1748 = vmatpush1.bf16.msra.mxu1 %v2876_v33 }
 0x275   :  { %1749 = vmatprep.subr.bf16.mxu1 %v2884_v34 }
 0x276   :  { %1608 = vmatpush1.bf16.msra.mxu0 %v2879_v35 }
 0x277   :  { %1609 = vmatprep.subr.bf16.mxu0 %v2887_v36 }
 0x278   :  { %1750 = vmatpush1.bf16.msra.mxu1 %v2882_v37 }
 0x279   :  { %1751 = vmatprep.subr.bf16.mxu1 %v2890_v38 }
 0x27a   :  { %1610 = vmatpush1.bf16.msra.mxu0 %v2885_v39 }
 0x27b   :  { %1611 = vmatprep.subr.bf16.mxu0 %v2893_v40 }
 0x27c   :  { %1752 = vmatpush1.bf16.msra.mxu1 %v2888_v41 }
 0x27d   :  { %1753 = vmatprep.subr.bf16.mxu1 %v2896_v42  ;;  %v1349_v42 = vlaneseq }
 0x27e   :  { %1612 = vmatpush1.bf16.msra.mxu0 %v2891_v44 }
 0x27f   :  { %1613 = vmatprep.subr.bf16.mxu0 %v2899_v45 }
 0x280   :  { %1754 = vmatpush1.bf16.msra.mxu1 %v2894_v46 }
 0x281   :  { %1755 = vmatprep.subr.bf16.mxu1 %v2902_v47  ;;  %v1350_v47 = vshrl.u32 %v1349_v42, 7 }
 0x282   :  { %1614 = vmatpush1.bf16.msra.mxu0 %v2897_v48 }
 0x283   :  { %1615 = vmatprep.subr.bf16.mxu0 %v2905_v49  ;;  %v1351_v48 = vsub.s32 0, %v1350_v47  ;;  %v1210_v49 = vld [vmem:[%s3450_s7] sm:$0x3] }
 0x284   :  { %1756 = vmatpush1.bf16.msra.mxu1 %v2900_v50  ;;  %v1355_v50 = vsub.s32 1, %v1350_v47 }
 0x285   :  { %1757 = vmatprep.subr.bf16.mxu1 %v2908_v51  ;;  %v1352_v51 = vrot.slane %v1210_v49, %v1351_v48 }
 0x286   :  { %1616 = vmatpush1.bf16.msra.mxu0 %v2903_v52  ;;  %v1356_v52 = vrot.slane %v1210_v49, %v1355_v50 }
 0x287   :  { %1617 = vmatprep.subr.bf16.mxu0 %v2911_v53 }
 0x288   :  { %1758 = vmatpush1.bf16.msra.mxu1 %v2906_v54 }
 0x289   :  { %1759 = vmatprep.subr.bf16.mxu1 %v2914_v55 }
 0x28a   :  { %1618 = vmatpush1.bf16.msra.mxu0 %v2909_v56 }
 0x28b   :  { %1887 = vmatprep.subr.bf16.mxu0 %v2917_v58 }
 0x28c   :  { %1760 = vmatpush1.bf16.msra.mxu1 %v2912_v59 }
 0x28d   :  { %1636 = vmatmul.mubr.bf16.vlgmr.msra.gmra.mxu0 %v1521_v61  ;;  %2553 = vmatprep.subr.bf16.mxu1 %v2939_v13 }
 0x28e   :  { %1888 = vmatpush1.bf16.msra.mxu0 %v2915_v60  ;;  %1919 = vmatprep.mubr.bf16.mxu0 %v3120_v57  ;;  %v2933_v57 = vld [vmem:[#allocation9 + $0x210] ss:$8 sps:$4 sm:$0xff]  }
 0x28f   :  { %1778 = vmatmul.mubr.bf16.vlgmr.msra.gmra.mxu1 %v1663_v63  ;;  %1889 = vmatprep.subr.bf16.mxu0 %v2920_v62 }
 0x290   :  { %2554 = vmatpush3.bf16.msra.mxu1 %v2940_v14 }
 0x291   :  { %2555 = vmatprep.subr.bf16.mxu1 %v2941_v15 }
 0x292   :  { %1890 = vmatpush1.bf16.msra.mxu0 %v2918_v0 }
 0x293   :  { %1891 = vmatprep.subr.bf16.mxu0 %v2923_v1 }
 0x294   :  { %2556 = vmatpush3.bf16.msra.mxu1 %v2942_v16 }
 0x295   :  { %2557 = vmatprep.subr.bf16.mxu1 %v2943_v17 }
 0x296   :  { %1892 = vmatpush1.bf16.msra.mxu0 %v2921_v2 }
 0x297   :  { %1893 = vmatprep.subr.bf16.mxu0 %v2926_v3 }
 0x298   :  { %2558 = vmatpush3.bf16.msra.mxu1 %v2944_v18 }
 0x299   :  { %2559 = vmatprep.subr.bf16.mxu1 %v2945_v19 }
 0x29a   :  { %1894 = vmatpush1.bf16.msra.mxu0 %v2924_v4 }
 0x29b   :  { %1895 = vmatprep.subr.bf16.mxu0 %v2929_v5 }
 0x29c   :  { %2560 = vmatpush3.bf16.msra.mxu1 %v2946_v20 }
 0x29d   :  { %2561 = vmatprep.subr.bf16.mxu1 %v2947_v21 }
 0x29e   :  { %1896 = vmatpush1.bf16.msra.mxu0 %v2927_v6 }
 0x29f   :  { %1897 = vmatprep.subr.bf16.mxu0 %v2932_v7 }
 0x2a0   :  { %2562 = vmatpush3.bf16.msra.mxu1 %v2948_v22 }
 0x2a1   :  { %2563 = vmatprep.subr.bf16.mxu1 %v2949_v23 }
 0x2a2   :  { %1898 = vmatpush1.bf16.msra.mxu0 %v2930_v8  ;;  %v2955_v8 = vld [vmem:[#allocation11 + $0x18] sm:$0xff]  }
 0x2a3   :  { %1899 = vmatprep.subr.bf16.mxu0 %v2935_v9  ;;  %v2956_v9 = vld [vmem:[#allocation11 + $0x10] sm:$0xff]  }
 0x2a4   :  { %2564 = vmatpush3.bf16.msra.mxu1 %v2950_v24 }
 0x2a5   :  { %2565 = vmatprep.subr.bf16.mxu1 %v2951_v25 }
 0x2a6   :  { %1900 = vmatpush1.bf16.msra.mxu0 %v2933_v57  ;;  %v2957_v57 = vld [vmem:[#allocation11 + $0x8] sm:$0xff]  }
 0x2a7   :  { %1901 = vmatprep.subr.bf16.mxu0 %v2938_v10  ;;  %v2958_v10 = vld [vmem:[#allocation11] sm:$0xff]  }
 0x2a8   :  { %2566 = vmatpush3.bf16.msra.mxu1 %v2952_v26 }
 0x2a9   :  { %2567 = vmatprep.subr.bf16.mxu1 %v2953_v27 }
 0x2aa   :  { %1902 = vmatpush1.bf16.msra.mxu0 %v2936_v11 }
 0x2ab   :  { %2700 = vmatprep.subr.bf16.mxu0 %v3118_v43 }
 0x2ac   :  { %2568 = vmatpush3.bf16.msra.mxu1 %v2954_v28 }
 0x2ad   :  { %1920 = vmatmul.mubr.bf16.vlgmr.msra.gmra.mxu0 %v1805_v12  ;;  %v2418_v12 = vld [vmem:[%s3452_s9] ss:$0 sm:$0xff]  ;;  %s3079_s9 = scalar_lea.vmem %s2202_s23, 32 }
 0x2ae   :  { %2708 = vmatprep.mubr.msk.bf16.mxu0 %vm3119_vm0, %v3118_v43  ;;  %2701 = vmatpush3.bf16.msra.mxu0 %v2955_v8  ;;  %p3080_p11 = scmp.ne.s32.totalorder %s2202_s23, %s3079_s9  ;;  %p3085_p13 = scmp.lt.s32.totalorder %s3079_s9, %s3079_s9 }
 0x2af   :  { %2702 = vmatprep.subr.bf16.mxu0 %v3118_v43 }
 0x2b0   :  { %p3086_p0 = por %p3085_p13, %p3084_p12 }
 0x2b2   :  { %2703 = vmatpush3.bf16.msra.mxu0 %v2956_v9  ;;  %p3087_p1 = pnand %p3086_p0, %p3080_p11 }
 0x2b3   :  { %2704 = vmatprep.subr.bf16.mxu0 %v3118_v43 }
 0x2b6   :  { %2705 = vmatpush3.bf16.msra.mxu0 %v2957_v57 }
 0x2b7   :  { %2706 = vmatprep.subr.bf16.mxu0 %v3118_v43  ;;  %v2435_v43 = vld [vmem:[%s3454_s11] ss:$0 sm:$0xff] }
 0x2ba   :  { %2707 = vmatpush3.bf16.msra.mxu0 %v2958_v10 }
 0x32d   :  { %v1341_v29 = vpop.f32.mrf.mxu0 }
 0x32e   :  { %v1359_v53 = vadd.f32 %v1352_v51, %v1341_v29 }
 0x32f   :  { %v1343_v30 = vpop.f32.mrf.mxu0  ;;  %v1495_v31 = vpop.f32.mrf.mxu1 }
 0x330   :  { %v1360_v54 = vadd.f32 %v1356_v52, %v1343_v30  ;;  %v1502_v55 = vadd.f32 %v1495_v31, %v1359_v53 }
 0x331   :  { %v1345_v32 = vpop.f32.mrf.mxu0  ;;  %v1497_v33 = vpop.f32.mrf.mxu1 }
 0x332   :  { %v1503_v56 = vadd.f32 %v1497_v33, %v1360_v54 }
 0x333   :  { %v1346_v34 = vpop.f32.mrf.mxu0  ;;  %v1499_v35 = vpop.f32.mrf.mxu1 }
 0x335   :  { %v1500_v36 = vpop.f32.mrf.mxu1 }
 0x34d   :  { %v1637_v37 = vpop.f32.mrf.mxu0 }
 0x34e   :  { %v1644_v58 = vadd.f32 %v1637_v37, %v1502_v55 }
 0x34f   :  { %v1639_v38 = vpop.f32.mrf.mxu0  ;;  %v1779_v39 = vpop.f32.mrf.mxu1 }
 0x350   :  { %v1645_v59 = vadd.f32 %v1639_v38, %v1503_v56  ;;  %v1786_v60 = vadd.f32 %v1779_v39, %v1644_v58 }
 0x351   :  { %v1641_v40 = vpop.f32.mrf.mxu0  ;;  %v1781_v41 = vpop.f32.mrf.mxu1 }
 0x352   :  { %v1787_v62 = vadd.f32 %v1781_v41, %v1645_v59 }
 0x353   :  { %v1642_v44 = vpop.f32.mrf.mxu0  ;;  %v1783_v45 = vpop.f32.mrf.mxu1 }
 0x355   :  { %v1784_v46 = vpop.f32.mrf.mxu1 }
 0x36d   :  { %v1921_v61 = vpop.f32.mrf.mxu0 }
 0x36e   :  { %v1928_v63 = vadd.f32 %v1921_v61, %v1786_v60 }
 0x36f   :  { %v1923_v0 = vpop.f32.mrf.mxu0 }
 0x370   :  { %v1929_v1 = vadd.f32 %v1923_v0, %v1787_v62  ;;  %2973 = vtanh.f32 %v1928_v63 }
 0x371   :  { %v1925_v2 = vpop.f32.mrf.mxu0 }
 0x372   :  { %2975 = vtanh.f32 %v1929_v1 }
 0x373   :  { %v1926_v3 = vpop.f32.mrf.mxu0 }
 0x37d   :  { %v2974_v4 = vpop.eup %2973 }
 0x37e   :  { %v1932_v7 = vpack.c.bf16 %v2974_v4, %v2974_v4 }
 0x37f   :  { %v2976_v5 = vpop.eup %2975 }
 0x380   :  { %v1933_v6 = vpack.c.bf16 %v2976_v5, %v2976_v5 }
 0x382   :  { %2101 = vmatprep.mubr.bf16.mxu1 %v1933_v6 }
 0x383   :  { %2102 = vmatmul.mubr.bf16.vlgmr.msra.gmra.mxu1 %v1932_v7 }
 0x443   :  { %v2569_v11 = vpop.f32.mrf.mxu1 }
 0x445   :  { %v2570_v13 = vpop.f32.mrf.mxu1 }
 0x446   :  { %v2571_v14 = vadd.f32 %v2570_v13, %v2569_v11 }
 0x447   :  { %v2572_v15 = vpop.f32.mrf.mxu1 }
 0x448   :  { %v2104_v16 = vadd.f32 %v2571_v14, %v2418_v12 }
 0x449   :  { %v2573_v17 = vpop.f32.mrf.mxu1 }
 0x44a   :  { %2977 = vtanh.f32 %v2104_v16 }
 0x457   :  { %v2978_v18 = vpop.eup %2977 }
 0x458   :  { %v2110_v19 = vpack.c.bf16 %v2978_v18, %v2978_v18 }
 0x45a   :  { %2709 = vmatmul.mubr.msk.bf16.vlgmr.msra.gmra.mxu0 %vm2150_vm2, %v2110_v19 }
 0x51a   :  { %v2188_v20 = vpop.f32.mrf.mxu0 }
 0x51b   :  { %v2189_v21 = vadd.f32 %v2435_v43, %v2188_v20 }
 0x51c   :  { %v2710_v22 = vpop.f32.mrf.mxu0 }
 0x51d   :  { %2194 = vst [vmem:[#allocation12] sm:$0x3] %v2189_v21 }
 0x51e   :  { %v2191_v23 = vpop.f32.mrf.mxu0 }
 0x51f   :  { %3090 = shalt.err (!%p3087_p1)
}
 0x520   :  { %2204 = dma.vmem_to_hbm [thread:$0]  %s2202_s23, 32, %s3455_s12, [#allocation5]   ;;  %v2711_v24 = vpop.f32.mrf.mxu0 }
 0x521   :  { %3105 = dma.done.wait [#allocation5], 32  }
 0x522   :  { %3106 = vsyncadd [#allocation5], 4294967264 }
 0x523   :  { %2208 = vsyncpa [#allocation4], 1 }
 0x524   :  { %2209 = vsyncpa [#allocation7], 1 }
 0x525   :  { %2210 = vsyncpa [#allocation10], 1 }
 0x526   :  { %2211 = vsyncpa [#allocation5], 1 }

</bundles_post_ra>
